<compile_context>
chip_gen: v7x
topology: tpu7x:2x2x1
jax: 0.10.0
libtpu: 0.0.40
codegen_flags: <defaults>
</compile_context>

<pallas_src>
import jax
import jax.numpy as jnp
from jax.experimental import pallas as pl
from jax.experimental.pallas import tpu as pltpu

# ---------------- config (small synthetic BERT-base-like model) ----------------
B = 2            # batch
S = 8            # sequence length
H = 32           # hidden size (bert-base uses 768)
NH = 4           # attention heads
HD = H // NH     # head dim
FFN = 4 * H      # FFN intermediate
VOCAB = 64
NUM_LAYERS = 12
L = NUM_LAYERS   # number of stacked CLS embeddings (hidden_states[1..12])
NUM_FILTERS = 8
KSIZES = (2, 3, 4)
NUM_CLASSES = 7
LN_EPS = 1e-12


def _layer_norm(x, g, b):
    mu = jnp.mean(x, axis=-1, keepdims=True)
    var = jnp.mean((x - mu) ** 2, axis=-1, keepdims=True)
    return (x - mu) * jax.lax.rsqrt(var + LN_EPS) * g + b


# ----------------------------- fused model kernel -------------------------------
def fused_kernel(x0_ref, maskb_ref,
                 wqkv_ref, bqkv_ref, wo_ref, bo_ref, ln1g_ref, ln1b_ref,
                 w1_ref, b1_ref, w2_ref, b2_ref, ln2g_ref, ln2b_ref,
                 wc2_ref, bc2_ref, wc3_ref, bc3_ref, wc4_ref, bc4_ref,
                 fcw_ref, fcb_ref, onehot_ref,
                 logits_ref, loss_ref,
                 x_scr, cls_scr):
    lidx = pl.program_id(0)

    # Load the embedding output into the persistent activation scratch at step 0.
    @pl.when(lidx == 0)
    def _():
        x_scr[...] = x0_ref[...]

    x = x_scr[...]                                      # (B*S, H)
    maskb = maskb_ref[...]                              # (B, 1, S) additive mask bias

    # --- encoder layer l (weights for this layer streamed in via BlockSpec) ---
    # Fused QKV projection: one MXU matmul instead of three.
    qkv = jnp.dot(x, wqkv_ref[...], preferred_element_type=jnp.float32) + bqkv_ref[...]

    scale = 1.0 / (HD ** 0.5)
    ctx_heads = []
    for n in range(NH):                                 # static unrolled head loop
        qn = qkv[:, n * HD:(n + 1) * HD].reshape(B, S, HD)
        kn = qkv[:, H + n * HD:H + (n + 1) * HD].reshape(B, S, HD)
        vn = qkv[:, 2 * H + n * HD:2 * H + (n + 1) * HD].reshape(B, S, HD)
        s = jnp.einsum('bqd,bkd->bqk', qn, kn, preferred_element_type=jnp.float32)
        s = s * scale + maskb                           # (B, S, S) + (B, 1, S)
        m = jnp.max(s, axis=-1, keepdims=True)
        e = jnp.exp(s - m)
        # EUP reciprocal instead of a VALU divide.
        p = e * pl.reciprocal(jnp.sum(e, axis=-1, keepdims=True), approx=True)
        ctx_heads.append(jnp.einsum('bqk,bkd->bqd', p, vn,
                                    preferred_element_type=jnp.float32))
    ctx = jnp.concatenate(ctx_heads, axis=-1).reshape(B * S, H)

    attn = jnp.dot(ctx, wo_ref[...], preferred_element_type=jnp.float32) + bo_ref[...]
    y = _layer_norm(x + attn, ln1g_ref[...], ln1b_ref[...])

    h = jnp.dot(y, w1_ref[...], preferred_element_type=jnp.float32) + b1_ref[...]
    h = jax.nn.gelu(h, approximate=True)   # TODO(synk): HF BERT uses exact erf GELU.
    z = jnp.dot(h, w2_ref[...], preferred_element_type=jnp.float32) + b2_ref[...]
    out = _layer_norm(y + z, ln2g_ref[...], ln2b_ref[...])

    x_scr[...] = out                                    # carry activation to next step
    cls_scr[lidx] = out.reshape(B, S, H)[:, 0, :]       # hidden_states[l+1][:, 0, :]

    # --- TextCNN head + cross-entropy epilogue on the last grid step ---
    @pl.when(lidx == NUM_LAYERS - 1)
    def _():
        cls_all = cls_scr[...]                          # (L, B, H)
        convs = ((2, wc2_ref, bc2_ref), (3, wc3_ref, bc3_ref), (4, wc4_ref, bc4_ref))
        rows = []
        for b in range(B):                              # static batch loop (B small)
            xb = cls_all[:, b, :]                       # (L, H)
            per_k = []
            for ksz, w_ref, b_ref in convs:
                lout = L - ksz + 1
                # Unfold windows -> single matmul per kernel size.
                win = jnp.concatenate([xb[j:j + lout, :] for j in range(ksz)], axis=-1)
                act = jnp.dot(win, w_ref[...],
                              preferred_element_type=jnp.float32) + b_ref[...]
                act = jnp.maximum(act, 0.0)                           # ReLU
                per_k.append(jnp.max(act, axis=0, keepdims=True))     # max-pool over time
            rows.append(jnp.concatenate(per_k, axis=-1))              # (1, 3F)
        feat = jnp.concatenate(rows, axis=0)                          # (B, 3F)

        # TODO(synk): nn.Dropout omitted (eval-mode identity).
        logits = jnp.dot(feat, fcw_ref[...],
                         preferred_element_type=jnp.float32) + fcb_ref[...]
        logits_ref[...] = logits                                      # (B, C)

        onehot = onehot_ref[...]                                      # (B, C)
        m = jnp.max(logits, axis=-1, keepdims=True)
        lse = m + jnp.log(jnp.sum(jnp.exp(logits - m), axis=-1, keepdims=True))
        tgt = jnp.sum(logits * onehot, axis=-1, keepdims=True)
        loss_ref[...] = jnp.sum(lse - tgt, axis=0, keepdims=True) * (1.0 / B)


def fused_bert_textcnn(x0, mask_bias, lp, tp, onehot):
    args = (x0, mask_bias,
            lp['wqkv'], lp['bqkv'], lp['wo'], lp['bo'], lp['ln1g'], lp['ln1b'],
            lp['w1'], lp['b1'], lp['w2'], lp['b2'], lp['ln2g'], lp['ln2b'],
            tp['wc'][2], tp['bc'][2], tp['wc'][3], tp['bc'][3],
            tp['wc'][4], tp['bc'][4], tp['fc_w'], tp['fc_b'], onehot)

    def full(shape):
        return pl.BlockSpec(shape, lambda l, _s=shape: (0,) * len(_s))

    def per_layer(shape):   # trailing (non-L) dims; leading L dim squeezed out
        return pl.BlockSpec((None,) + shape, lambda l, _s=shape: (l,) + (0,) * len(_s))

    in_specs = [
        full((B * S, H)),                                  # x0 (embedding output)
        full((B, 1, S)),                                   # additive attention mask
        per_layer((H, 3 * H)), per_layer((1, 3 * H)),      # wqkv, bqkv
        per_layer((H, H)), per_layer((1, H)),              # wo, bo
        per_layer((1, H)), per_layer((1, H)),              # ln1 g/b
        per_layer((H, FFN)), per_layer((1, FFN)),          # w1, b1
        per_layer((FFN, H)), per_layer((1, H)),            # w2, b2
        per_layer((1, H)), per_layer((1, H)),              # ln2 g/b
        full((2 * H, NUM_FILTERS)), full((1, NUM_FILTERS)),
        full((3 * H, NUM_FILTERS)), full((1, NUM_FILTERS)),
        full((4 * H, NUM_FILTERS)), full((1, NUM_FILTERS)),
        full((len(KSIZES) * NUM_FILTERS, NUM_CLASSES)), full((1, NUM_CLASSES)),
        full((B, NUM_CLASSES)),                            # one-hot labels
    ]
    out_specs = (full((B, NUM_CLASSES)), full((1, 1)))

    grid_spec = pltpu.PrefetchScalarGridSpec(
        num_scalar_prefetch=0,
        grid=(NUM_LAYERS,),
        in_specs=in_specs,
        out_specs=out_specs,
        scratch_shapes=[pltpu.VMEM((B * S, H), jnp.float32),   # persistent activation
                        pltpu.VMEM((L, B, H), jnp.float32)],   # stacked CLS rows
    )
    return pl.pallas_call(
        fused_kernel,
        out_shape=(jax.ShapeDtypeStruct((B, NUM_CLASSES), jnp.float32),
                   jax.ShapeDtypeStruct((1, 1), jnp.float32)),
        grid_spec=grid_spec,
        compiler_params=pltpu.CompilerParams(
            dimension_semantics=("arbitrary",),
            vmem_limit_bytes=32 * 1024 * 1024),
    )(*args)


# ------------------------------ plain-JAX glue -----------------------------------
def bert_embed(input_ids, p):
    x = p['word_emb'][input_ids]                                   # (B, S, H)
    x = x + p['pos_emb'][None, :, :] + p['type_emb'][0][None, None, :]
    mu = x.mean(-1, keepdims=True)
    var = ((x - mu) ** 2).mean(-1, keepdims=True)
    x = (x - mu) / jnp.sqrt(var + LN_EPS) * p['emb_ln_g'] + p['emb_ln_b']
    return x.reshape(B * S, H)


def bert_textcnn_forward(params, input_ids, attention_mask, labels):
    x0 = bert_embed(input_ids, params['emb'])
    mask_bias = ((1.0 - attention_mask.astype(jnp.float32)) * -1e9)[:, None, :]  # (B,1,S)
    onehot = jax.nn.one_hot(labels, NUM_CLASSES, dtype=jnp.float32)
    logits, loss = fused_bert_textcnn(x0, mask_bias, params['layers'],
                                      params['textcnn'], onehot)
    return {'logits': logits, 'loss': loss[0, 0]}


# -------------------------- deterministic parameter init -------------------------
def init_params(key):
    std = 0.02
    keys = iter(jax.random.split(key, 64))

    def norm(shape):
        return (std * jax.random.normal(next(keys), shape)).astype(jnp.float32)

    emb = dict(
        word_emb=norm((VOCAB, H)),
        pos_emb=norm((S, H)),
        type_emb=norm((2, H)),
        emb_ln_g=jnp.ones((H,), jnp.float32),
        emb_ln_b=jnp.zeros((H,), jnp.float32),
    )
    # Per-layer weights stacked along a leading (NUM_LAYERS,) axis.
    layers = dict(
        wqkv=norm((L, H, 3 * H)), bqkv=jnp.zeros((L, 1, 3 * H), jnp.float32),
        wo=norm((L, H, H)), bo=jnp.zeros((L, 1, H), jnp.float32),
        ln1g=jnp.ones((L, 1, H), jnp.float32), ln1b=jnp.zeros((L, 1, H), jnp.float32),
        w1=norm((L, H, FFN)), b1=jnp.zeros((L, 1, FFN), jnp.float32),
        w2=norm((L, FFN, H)), b2=jnp.zeros((L, 1, H), jnp.float32),
        ln2g=jnp.ones((L, 1, H), jnp.float32), ln2b=jnp.zeros((L, 1, H), jnp.float32),
    )
    # Conv weights stored pre-flattened as (k*H, F) to match the unfolded windows.
    textcnn = dict(
        wc={k: norm((k * H, NUM_FILTERS)) for k in KSIZES},
        bc={k: norm((1, NUM_FILTERS)) for k in KSIZES},
        fc_w=norm((len(KSIZES) * NUM_FILTERS, NUM_CLASSES)),
        fc_b=norm((1, NUM_CLASSES)),
    )
    return dict(emb=emb, layers=layers, textcnn=textcnn)


if __name__ == "__main__":
    root = jax.random.PRNGKey(0)
    k_param, k_ids, k_lab = jax.random.split(root, 3)

    params = init_params(k_param)
    input_ids = jax.random.randint(k_ids, (B, S), 0, VOCAB, dtype=jnp.int32)
    attention_mask = jnp.ones((B, S), jnp.int32)
    labels = jax.random.randint(k_lab, (B,), 0, NUM_CLASSES, dtype=jnp.int32)

    fwd = jax.jit(bert_textcnn_forward)
    out = fwd(params, input_ids, attention_mask, labels)
    logits = jax.block_until_ready(out['logits'])
    loss = jax.block_until_ready(out['loss'])

    assert logits.shape == (B, NUM_CLASSES)
    assert loss.shape == ()
    assert bool(jnp.all(jnp.isfinite(logits))) and bool(jnp.isfinite(loss))
    print("KERNEL_OK")
</pallas_src>

<mosaic_0001>
module attributes {stable_mosaic.version = 11 : i64} {
  func.func @fused_kernel(%arg0: i32, %arg1: memref<16x32xf32, #tpu.memory_space<vmem>>, %arg2: memref<2x1x8xf32, #tpu.memory_space<vmem>>, %arg3: memref<1x32x96xf32, #tpu.memory_space<vmem>>, %arg4: memref<1x1x96xf32, #tpu.memory_space<vmem>>, %arg5: memref<1x32x32xf32, #tpu.memory_space<vmem>>, %arg6: memref<1x1x32xf32, #tpu.memory_space<vmem>>, %arg7: memref<1x1x32xf32, #tpu.memory_space<vmem>>, %arg8: memref<1x1x32xf32, #tpu.memory_space<vmem>>, %arg9: memref<1x32x128xf32, #tpu.memory_space<vmem>>, %arg10: memref<1x1x128xf32, #tpu.memory_space<vmem>>, %arg11: memref<1x128x32xf32, #tpu.memory_space<vmem>>, %arg12: memref<1x1x32xf32, #tpu.memory_space<vmem>>, %arg13: memref<1x1x32xf32, #tpu.memory_space<vmem>>, %arg14: memref<1x1x32xf32, #tpu.memory_space<vmem>>, %arg15: memref<64x8xf32, #tpu.memory_space<vmem>>, %arg16: memref<1x8xf32, #tpu.memory_space<vmem>>, %arg17: memref<96x8xf32, #tpu.memory_space<vmem>>, %arg18: memref<1x8xf32, #tpu.memory_space<vmem>>, %arg19: memref<128x8xf32, #tpu.memory_space<vmem>>, %arg20: memref<1x8xf32, #tpu.memory_space<vmem>>, %arg21: memref<24x7xf32, #tpu.memory_space<vmem>>, %arg22: memref<1x7xf32, #tpu.memory_space<vmem>>, %arg23: memref<2x7xf32, #tpu.memory_space<vmem>>, %arg24: memref<2x7xf32, #tpu.memory_space<vmem>>, %arg25: memref<1x1xf32, #tpu.memory_space<vmem>>, %arg26: memref<16x32xf32, #tpu.memory_space<vmem>>, %arg27: memref<12x2x32xf32, #tpu.memory_space<vmem>>) attributes {dimension_semantics = [#tpu.dimension_semantics<arbitrary>], iteration_bounds = array<i64: 12>, scalar_prefetch = 0 : i64, scratch_operands = 2 : i64, tpu.core_type = #tpu.core_type<tc>, window_params = [{pipeline_mode = #tpu.pipeline_mode<synchronous>, transform_indices = @transform_0, window_bounds = array<i64: 16, 32>}, {pipeline_mode = #tpu.pipeline_mode<synchronous>, transform_indices = @transform_1, window_bounds = array<i64: 2, 1, 8>}, {transform_indices = @transform_2, window_bounds = array<i64: 1, 32, 96>}, {transform_indices = @transform_3, window_bounds = array<i64: 1, 1, 96>}, {transform_indices = @transform_4, window_bounds = array<i64: 1, 32, 32>}, {transform_indices = @transform_5, window_bounds = array<i64: 1, 1, 32>}, {transform_indices = @transform_6, window_bounds = array<i64: 1, 1, 32>}, {transform_indices = @transform_7, window_bounds = array<i64: 1, 1, 32>}, {transform_indices = @transform_8, window_bounds = array<i64: 1, 32, 128>}, {transform_indices = @transform_9, window_bounds = array<i64: 1, 1, 128>}, {transform_indices = @transform_10, window_bounds = array<i64: 1, 128, 32>}, {transform_indices = @transform_11, window_bounds = array<i64: 1, 1, 32>}, {transform_indices = @transform_12, window_bounds = array<i64: 1, 1, 32>}, {transform_indices = @transform_13, window_bounds = array<i64: 1, 1, 32>}, {pipeline_mode = #tpu.pipeline_mode<synchronous>, transform_indices = @transform_14, window_bounds = array<i64: 64, 8>}, {pipeline_mode = #tpu.pipeline_mode<synchronous>, transform_indices = @transform_15, window_bounds = array<i64: 1, 8>}, {pipeline_mode = #tpu.pipeline_mode<synchronous>, transform_indices = @transform_16, window_bounds = array<i64: 96, 8>}, {pipeline_mode = #tpu.pipeline_mode<synchronous>, transform_indices = @transform_17, window_bounds = array<i64: 1, 8>}, {pipeline_mode = #tpu.pipeline_mode<synchronous>, transform_indices = @transform_18, window_bounds = array<i64: 128, 8>}, {pipeline_mode = #tpu.pipeline_mode<synchronous>, transform_indices = @transform_19, window_bounds = array<i64: 1, 8>}, {pipeline_mode = #tpu.pipeline_mode<synchronous>, transform_indices = @transform_20, window_bounds = array<i64: 24, 7>}, {pipeline_mode = #tpu.pipeline_mode<synchronous>, transform_indices = @transform_21, window_bounds = array<i64: 1, 7>}, {pipeline_mode = #tpu.pipeline_mode<synchronous>, transform_indices = @transform_22, window_bounds = array<i64: 2, 7>}, {pipeline_mode = #tpu.pipeline_mode<synchronous>, transform_indices = @transform_23, window_bounds = array<i64: 2, 7>}, {pipeline_mode = #tpu.pipeline_mode<synchronous>, transform_indices = @transform_24, window_bounds = array<i64: 1, 1>}]} {
    %c0_i32 = arith.constant 0 : i32
    %0 = arith.cmpi eq, %arg0, %c0_i32 : i32
    %1 = arith.extui %0 : i1 to i32
    %c0_i32_0 = arith.constant 0 : i32
    %2 = arith.cmpi ne, %1, %c0_i32_0 : i32
    scf.if %2 {
      %c0_83 = arith.constant 0 : index
      %c0_84 = arith.constant 0 : index
      %201 = vector.load %arg1[%c0_83, %c0_84] : memref<16x32xf32, #tpu.memory_space<vmem>>, vector<16x32xf32>
      %c0_85 = arith.constant 0 : index
      %c0_86 = arith.constant 0 : index
      %202 = vector.load %arg26[%c0_85, %c0_86] : memref<16x32xf32, #tpu.memory_space<vmem>>, vector<16x32xf32>
      tpu.vector_store %arg26[%c0_85, %c0_86], %201 {strides = array<i32>} : memref<16x32xf32, #tpu.memory_space<vmem>>, vector<16x32xf32>,
    } else {
    }
    %c0 = arith.constant 0 : index
    %c0_1 = arith.constant 0 : index
    %3 = vector.load %arg26[%c0, %c0_1] : memref<16x32xf32, #tpu.memory_space<vmem>>, vector<16x32xf32>
    %c0_2 = arith.constant 0 : index
    %c0_3 = arith.constant 0 : index
    %c0_4 = arith.constant 0 : index
    %4 = vector.load %arg2[%c0_2, %c0_3, %c0_4] : memref<2x1x8xf32, #tpu.memory_space<vmem>>, vector<2x1x8xf32>
    %c0_5 = arith.constant 0 : index
    %c0_6 = arith.constant 0 : index
    %c0_7 = arith.constant 0 : index
    %5 = vector.load %arg3[%c0_5, %c0_6, %c0_7] : memref<1x32x96xf32, #tpu.memory_space<vmem>>, vector<1x32x96xf32>
    %6 = vector.shape_cast %5 : vector<1x32x96xf32> to vector<32x96xf32>
    %cst = arith.constant dense<0.000000e+00> : vector<16x96xf32>
    %7 = tpu.matmul %3, %6, %cst {dimension_numbers = #tpu.dot_dimension_numbers<[1], [0], [0], [1], [0, 0, 1, 1], [], []>} : vector<16x32xf32>, vector<32x96xf32>, vector<16x96xf32> -> vector<16x96xf32>
    %c0_8 = arith.constant 0 : index
    %c0_9 = arith.constant 0 : index
    %c0_10 = arith.constant 0 : index
    %8 = vector.load %arg4[%c0_8, %c0_9, %c0_10] : memref<1x1x96xf32, #tpu.memory_space<vmem>>, vector<1x1x96xf32>
    %9 = vector.shape_cast %8 : vector<1x1x96xf32> to vector<1x96xf32>
    %10 = vector.broadcast %9 : vector<1x96xf32> to vector<16x96xf32>
    %11 = arith.addf %7, %10 : vector<16x96xf32>
    %12 = vector.extract_strided_slice %11 {offsets = [0, 0], sizes = [16, 8], strides = [1, 1]} : vector<16x96xf32> to vector<16x8xf32>
    %13 = vector.shape_cast %12 : vector<16x8xf32> to vector<2x8x8xf32>
    %14 = vector.extract_strided_slice %11 {offsets = [0, 32], sizes = [16, 8], strides = [1, 1]} : vector<16x96xf32> to vector<16x8xf32>
    %15 = vector.shape_cast %14 : vector<16x8xf32> to vector<2x8x8xf32>
    %16 = vector.extract_strided_slice %11 {offsets = [0, 64], sizes = [16, 8], strides = [1, 1]} : vector<16x96xf32> to vector<16x8xf32>
    %17 = vector.shape_cast %16 : vector<16x8xf32> to vector<2x8x8xf32>
    "tpu.trace_start"() <{level = 10 : i32, message = "bqd,bkd->bqk"}> : () -> ()
    %cst_11 = arith.constant dense<0.000000e+00> : vector<2x8x8xf32>
    %18 = tpu.matmul %13, %15, %cst_11 {dimension_numbers = #tpu.dot_dimension_numbers<[2], [2], [1], [1], [0, 0, 0, 1, 1, 1], [0], [0]>} : vector<2x8x8xf32>, vector<2x8x8xf32>, vector<2x8x8xf32> -> vector<2x8x8xf32>
    "tpu.trace_stop"() : () -> ()
    %cst_12 = arith.constant 0.353553385 : f32
    %19 = vector.broadcast %cst_12 : f32 to vector<2x8x8xf32>
    %20 = arith.mulf %18, %19 : vector<2x8x8xf32>
    %21 = vector.broadcast %4 : vector<2x1x8xf32> to vector<2x8x8xf32>
    %22 = arith.addf %20, %21 : vector<2x8x8xf32>
    %cst_13 = arith.constant dense<0xFF800000> : vector<2x8xf32>
    %23 = vector.multi_reduction <maximumf>, %22, %cst_13 [2] : vector<2x8x8xf32> to vector<2x8xf32>
    %24 = vector.shape_cast %23 : vector<2x8xf32> to vector<2x8x1xf32>
    %25 = vector.broadcast %24 : vector<2x8x1xf32> to vector<2x8x8xf32>
    %26 = arith.subf %22, %25 : vector<2x8x8xf32>
    %27 = math.exp %26 : vector<2x8x8xf32>
    %cst_14 = arith.constant dense<0.000000e+00> : vector<2x8xf32>
    %28 = vector.multi_reduction <add>, %27, %cst_14 [2] : vector<2x8x8xf32> to vector<2x8xf32>
    %29 = vector.shape_cast %28 : vector<2x8xf32> to vector<2x8x1xf32>
    %30 = tpu.reciprocal %29 {approx = true} : vector<2x8x1xf32> -> vector<2x8x1xf32>
    %31 = vector.broadcast %30 : vector<2x8x1xf32> to vector<2x8x8xf32>
    %32 = arith.mulf %27, %31 : vector<2x8x8xf32>
    "tpu.trace_start"() <{level = 10 : i32, message = "bqk,bkd->bqd"}> : () -> ()
    %cst_15 = arith.constant dense<0.000000e+00> : vector<2x8x8xf32>
    %33 = tpu.matmul %32, %17, %cst_15 {dimension_numbers = #tpu.dot_dimension_numbers<[2], [1], [1], [2], [0, 0, 0, 1, 1, 2], [0], [0]>} : vector<2x8x8xf32>, vector<2x8x8xf32>, vector<2x8x8xf32> -> vector<2x8x8xf32>
    "tpu.trace_stop"() : () -> ()
    %34 = vector.extract_strided_slice %11 {offsets = [0, 8], sizes = [16, 8], strides = [1, 1]} : vector<16x96xf32> to vector<16x8xf32>
    %35 = vector.shape_cast %34 : vector<16x8xf32> to vector<2x8x8xf32>
    %36 = vector.extract_strided_slice %11 {offsets = [0, 40], sizes = [16, 8], strides = [1, 1]} : vector<16x96xf32> to vector<16x8xf32>
    %37 = vector.shape_cast %36 : vector<16x8xf32> to vector<2x8x8xf32>
    %38 = vector.extract_strided_slice %11 {offsets = [0, 72], sizes = [16, 8], strides = [1, 1]} : vector<16x96xf32> to vector<16x8xf32>
    %39 = vector.shape_cast %38 : vector<16x8xf32> to vector<2x8x8xf32>
    "tpu.trace_start"() <{level = 10 : i32, message = "bqd,bkd->bqk"}> : () -> ()
    %cst_16 = arith.constant dense<0.000000e+00> : vector<2x8x8xf32>
    %40 = tpu.matmul %35, %37, %cst_16 {dimension_numbers = #tpu.dot_dimension_numbers<[2], [2], [1], [1], [0, 0, 0, 1, 1, 1], [0], [0]>} : vector<2x8x8xf32>, vector<2x8x8xf32>, vector<2x8x8xf32> -> vector<2x8x8xf32>
    "tpu.trace_stop"() : () -> ()
    %cst_17 = arith.constant 0.353553385 : f32
    %41 = vector.broadcast %cst_17 : f32 to vector<2x8x8xf32>
    %42 = arith.mulf %40, %41 : vector<2x8x8xf32>
    %43 = vector.broadcast %4 : vector<2x1x8xf32> to vector<2x8x8xf32>
    %44 = arith.addf %42, %43 : vector<2x8x8xf32>
    %cst_18 = arith.constant dense<0xFF800000> : vector<2x8xf32>
    %45 = vector.multi_reduction <maximumf>, %44, %cst_18 [2] : vector<2x8x8xf32> to vector<2x8xf32>
    %46 = vector.shape_cast %45 : vector<2x8xf32> to vector<2x8x1xf32>
    %47 = vector.broadcast %46 : vector<2x8x1xf32> to vector<2x8x8xf32>
    %48 = arith.subf %44, %47 : vector<2x8x8xf32>
    %49 = math.exp %48 : vector<2x8x8xf32>
    %cst_19 = arith.constant dense<0.000000e+00> : vector<2x8xf32>
    %50 = vector.multi_reduction <add>, %49, %cst_19 [2] : vector<2x8x8xf32> to vector<2x8xf32>
    %51 = vector.shape_cast %50 : vector<2x8xf32> to vector<2x8x1xf32>
    %52 = tpu.reciprocal %51 {approx = true} : vector<2x8x1xf32> -> vector<2x8x1xf32>
    %53 = vector.broadcast %52 : vector<2x8x1xf32> to vector<2x8x8xf32>
    %54 = arith.mulf %49, %53 : vector<2x8x8xf32>
    "tpu.trace_start"() <{level = 10 : i32, message = "bqk,bkd->bqd"}> : () -> ()
    %cst_20 = arith.constant dense<0.000000e+00> : vector<2x8x8xf32>
    %55 = tpu.matmul %54, %39, %cst_20 {dimension_numbers = #tpu.dot_dimension_numbers<[2], [1], [1], [2], [0, 0, 0, 1, 1, 2], [0], [0]>} : vector<2x8x8xf32>, vector<2x8x8xf32>, vector<2x8x8xf32> -> vector<2x8x8xf32>
    "tpu.trace_stop"() : () -> ()
    %56 = vector.extract_strided_slice %11 {offsets = [0, 16], sizes = [16, 8], strides = [1, 1]} : vector<16x96xf32> to vector<16x8xf32>
    %57 = vector.shape_cast %56 : vector<16x8xf32> to vector<2x8x8xf32>
    %58 = vector.extract_strided_slice %11 {offsets = [0, 48], sizes = [16, 8], strides = [1, 1]} : vector<16x96xf32> to vector<16x8xf32>
    %59 = vector.shape_cast %58 : vector<16x8xf32> to vector<2x8x8xf32>
    %60 = vector.extract_strided_slice %11 {offsets = [0, 80], sizes = [16, 8], strides = [1, 1]} : vector<16x96xf32> to vector<16x8xf32>
    %61 = vector.shape_cast %60 : vector<16x8xf32> to vector<2x8x8xf32>
    "tpu.trace_start"() <{level = 10 : i32, message = "bqd,bkd->bqk"}> : () -> ()
    %cst_21 = arith.constant dense<0.000000e+00> : vector<2x8x8xf32>
    %62 = tpu.matmul %57, %59, %cst_21 {dimension_numbers = #tpu.dot_dimension_numbers<[2], [2], [1], [1], [0, 0, 0, 1, 1, 1], [0], [0]>} : vector<2x8x8xf32>, vector<2x8x8xf32>, vector<2x8x8xf32> -> vector<2x8x8xf32>
    "tpu.trace_stop"() : () -> ()
    %cst_22 = arith.constant 0.353553385 : f32
    %63 = vector.broadcast %cst_22 : f32 to vector<2x8x8xf32>
    %64 = arith.mulf %62, %63 : vector<2x8x8xf32>
    %65 = vector.broadcast %4 : vector<2x1x8xf32> to vector<2x8x8xf32>
    %66 = arith.addf %64, %65 : vector<2x8x8xf32>
    %cst_23 = arith.constant dense<0xFF800000> : vector<2x8xf32>
    %67 = vector.multi_reduction <maximumf>, %66, %cst_23 [2] : vector<2x8x8xf32> to vector<2x8xf32>
    %68 = vector.shape_cast %67 : vector<2x8xf32> to vector<2x8x1xf32>
    %69 = vector.broadcast %68 : vector<2x8x1xf32> to vector<2x8x8xf32>
    %70 = arith.subf %66, %69 : vector<2x8x8xf32>
    %71 = math.exp %70 : vector<2x8x8xf32>
    %cst_24 = arith.constant dense<0.000000e+00> : vector<2x8xf32>
    %72 = vector.multi_reduction <add>, %71, %cst_24 [2] : vector<2x8x8xf32> to vector<2x8xf32>
    %73 = vector.shape_cast %72 : vector<2x8xf32> to vector<2x8x1xf32>
    %74 = tpu.reciprocal %73 {approx = true} : vector<2x8x1xf32> -> vector<2x8x1xf32>
    %75 = vector.broadcast %74 : vector<2x8x1xf32> to vector<2x8x8xf32>
    %76 = arith.mulf %71, %75 : vector<2x8x8xf32>
    "tpu.trace_start"() <{level = 10 : i32, message = "bqk,bkd->bqd"}> : () -> ()
    %cst_25 = arith.constant dense<0.000000e+00> : vector<2x8x8xf32>
    %77 = tpu.matmul %76, %61, %cst_25 {dimension_numbers = #tpu.dot_dimension_numbers<[2], [1], [1], [2], [0, 0, 0, 1, 1, 2], [0], [0]>} : vector<2x8x8xf32>, vector<2x8x8xf32>, vector<2x8x8xf32> -> vector<2x8x8xf32>
    "tpu.trace_stop"() : () -> ()
    %78 = vector.extract_strided_slice %11 {offsets = [0, 24], sizes = [16, 8], strides = [1, 1]} : vector<16x96xf32> to vector<16x8xf32>
    %79 = vector.shape_cast %78 : vector<16x8xf32> to vector<2x8x8xf32>
    %80 = vector.extract_strided_slice %11 {offsets = [0, 56], sizes = [16, 8], strides = [1, 1]} : vector<16x96xf32> to vector<16x8xf32>
    %81 = vector.shape_cast %80 : vector<16x8xf32> to vector<2x8x8xf32>
    %82 = vector.extract_strided_slice %11 {offsets = [0, 88], sizes = [16, 8], strides = [1, 1]} : vector<16x96xf32> to vector<16x8xf32>
    %83 = vector.shape_cast %82 : vector<16x8xf32> to vector<2x8x8xf32>
    "tpu.trace_start"() <{level = 10 : i32, message = "bqd,bkd->bqk"}> : () -> ()
    %cst_26 = arith.constant dense<0.000000e+00> : vector<2x8x8xf32>
    %84 = tpu.matmul %79, %81, %cst_26 {dimension_numbers = #tpu.dot_dimension_numbers<[2], [2], [1], [1], [0, 0, 0, 1, 1, 1], [0], [0]>} : vector<2x8x8xf32>, vector<2x8x8xf32>, vector<2x8x8xf32> -> vector<2x8x8xf32>
    "tpu.trace_stop"() : () -> ()
    %cst_27 = arith.constant 0.353553385 : f32
    %85 = vector.broadcast %cst_27 : f32 to vector<2x8x8xf32>
    %86 = arith.mulf %84, %85 : vector<2x8x8xf32>
    %87 = vector.broadcast %4 : vector<2x1x8xf32> to vector<2x8x8xf32>
    %88 = arith.addf %86, %87 : vector<2x8x8xf32>
    %cst_28 = arith.constant dense<0xFF800000> : vector<2x8xf32>
    %89 = vector.multi_reduction <maximumf>, %88, %cst_28 [2] : vector<2x8x8xf32> to vector<2x8xf32>
    %90 = vector.shape_cast %89 : vector<2x8xf32> to vector<2x8x1xf32>
    %91 = vector.broadcast %90 : vector<2x8x1xf32> to vector<2x8x8xf32>
    %92 = arith.subf %88, %91 : vector<2x8x8xf32>
    %93 = math.exp %92 : vector<2x8x8xf32>
    %cst_29 = arith.constant dense<0.000000e+00> : vector<2x8xf32>
    %94 = vector.multi_reduction <add>, %93, %cst_29 [2] : vector<2x8x8xf32> to vector<2x8xf32>
    %95 = vector.shape_cast %94 : vector<2x8xf32> to vector<2x8x1xf32>
    %96 = tpu.reciprocal %95 {approx = true} : vector<2x8x1xf32> -> vector<2x8x1xf32>
    %97 = vector.broadcast %96 : vector<2x8x1xf32> to vector<2x8x8xf32>
    %98 = arith.mulf %93, %97 : vector<2x8x8xf32>
    "tpu.trace_start"() <{level = 10 : i32, message = "bqk,bkd->bqd"}> : () -> ()
    %cst_30 = arith.constant dense<0.000000e+00> : vector<2x8x8xf32>
    %99 = tpu.matmul %98, %83, %cst_30 {dimension_numbers = #tpu.dot_dimension_numbers<[2], [1], [1], [2], [0, 0, 0, 1, 1, 2], [0], [0]>} : vector<2x8x8xf32>, vector<2x8x8xf32>, vector<2x8x8xf32> -> vector<2x8x8xf32>
    "tpu.trace_stop"() : () -> ()
    %100 = tpu.concatenate %33, %55, %77, %99 in 2 : vector<2x8x8xf32>, vector<2x8x8xf32>, vector<2x8x8xf32>, vector<2x8x8xf32> -> vector<2x8x32xf32>
    %101 = vector.shape_cast %100 : vector<2x8x32xf32> to vector<16x32xf32>
    %c0_31 = arith.constant 0 : index
    %c0_32 = arith.constant 0 : index
    %c0_33 = arith.constant 0 : index
    %102 = vector.load %arg5[%c0_31, %c0_32, %c0_33] : memref<1x32x32xf32, #tpu.memory_space<vmem>>, vector<1x32x32xf32>
    %103 = vector.shape_cast %102 : vector<1x32x32xf32> to vector<32x32xf32>
    %cst_34 = arith.constant dense<0.000000e+00> : vector<16x32xf32>
    %104 = tpu.matmul %101, %103, %cst_34 {dimension_numbers = #tpu.dot_dimension_numbers<[1], [0], [0], [1], [0, 0, 1, 1], [], []>} : vector<16x32xf32>, vector<32x32xf32>, vector<16x32xf32> -> vector<16x32xf32>
    %c0_35 = arith.constant 0 : index
    %c0_36 = arith.constant 0 : index
    %c0_37 = arith.constant 0 : index
    %105 = vector.load %arg6[%c0_35, %c0_36, %c0_37] : memref<1x1x32xf32, #tpu.memory_space<vmem>>, vector<1x1x32xf32>
    %106 = vector.shape_cast %105 : vector<1x1x32xf32> to vector<1x32xf32>
    %107 = vector.broadcast %106 : vector<1x32xf32> to vector<16x32xf32>
    %108 = arith.addf %104, %107 : vector<16x32xf32>
    %109 = arith.addf %3, %108 : vector<16x32xf32>
    %c0_38 = arith.constant 0 : index
    %c0_39 = arith.constant 0 : index
    %c0_40 = arith.constant 0 : index
    %110 = vector.load %arg7[%c0_38, %c0_39, %c0_40] : memref<1x1x32xf32, #tpu.memory_space<vmem>>, vector<1x1x32xf32>
    %111 = vector.shape_cast %110 : vector<1x1x32xf32> to vector<1x32xf32>
    %c0_41 = arith.constant 0 : index
    %c0_42 = arith.constant 0 : index
    %c0_43 = arith.constant 0 : index
    %112 = vector.load %arg8[%c0_41, %c0_42, %c0_43] : memref<1x1x32xf32, #tpu.memory_space<vmem>>, vector<1x1x32xf32>
    %113 = vector.shape_cast %112 : vector<1x1x32xf32> to vector<1x32xf32>
    %cst_44 = arith.constant dense<0.000000e+00> : vector<16xf32>
    %114 = vector.multi_reduction <add>, %109, %cst_44 [1] : vector<16x32xf32> to vector<16xf32>
    %115 = vector.shape_cast %114 : vector<16xf32> to vector<16x1xf32>
    %cst_45 = arith.constant 3.200000e+01 : f32
    %116 = vector.broadcast %cst_45 : f32 to vector<16x1xf32>
    %117 = arith.divf %115, %116 : vector<16x1xf32>
    %118 = vector.broadcast %117 : vector<16x1xf32> to vector<16x32xf32>
    %119 = arith.subf %109, %118 : vector<16x32xf32>
    %120 = arith.mulf %119, %119 : vector<16x32xf32>
    %cst_46 = arith.constant dense<0.000000e+00> : vector<16xf32>
    %121 = vector.multi_reduction <add>, %120, %cst_46 [1] : vector<16x32xf32> to vector<16xf32>
    %122 = vector.shape_cast %121 : vector<16xf32> to vector<16x1xf32>
    %cst_47 = arith.constant 3.200000e+01 : f32
    %123 = vector.broadcast %cst_47 : f32 to vector<16x1xf32>
    %124 = arith.divf %122, %123 : vector<16x1xf32>
    %125 = vector.broadcast %117 : vector<16x1xf32> to vector<16x32xf32>
    %126 = arith.subf %109, %125 : vector<16x32xf32>
    %cst_48 = arith.constant 9.99999996E-13 : f32
    %127 = vector.broadcast %cst_48 : f32 to vector<16x1xf32>
    %128 = arith.addf %124, %127 : vector<16x1xf32>
    %129 = math.rsqrt %128 : vector<16x1xf32>
    %130 = vector.broadcast %129 : vector<16x1xf32> to vector<16x32xf32>
    %131 = arith.mulf %126, %130 : vector<16x32xf32>
    %132 = vector.broadcast %111 : vector<1x32xf32> to vector<16x32xf32>
    %133 = arith.mulf %131, %132 : vector<16x32xf32>
    %134 = vector.broadcast %113 : vector<1x32xf32> to vector<16x32xf32>
    %135 = arith.addf %133, %134 : vector<16x32xf32>
    %c0_49 = arith.constant 0 : index
    %c0_50 = arith.constant 0 : index
    %c0_51 = arith.constant 0 : index
    %136 = vector.load %arg9[%c0_49, %c0_50, %c0_51] : memref<1x32x128xf32, #tpu.memory_space<vmem>>, vector<1x32x128xf32>
    %137 = vector.shape_cast %136 : vector<1x32x128xf32> to vector<32x128xf32>
    %cst_52 = arith.constant dense<0.000000e+00> : vector<16x128xf32>
    %138 = tpu.matmul %135, %137, %cst_52 {dimension_numbers = #tpu.dot_dimension_numbers<[1], [0], [0], [1], [0, 0, 1, 1], [], []>} : vector<16x32xf32>, vector<32x128xf32>, vector<16x128xf32> -> vector<16x128xf32>
    %c0_53 = arith.constant 0 : index
    %c0_54 = arith.constant 0 : index
    %c0_55 = arith.constant 0 : index
    %139 = vector.load %arg10[%c0_53, %c0_54, %c0_55] : memref<1x1x128xf32, #tpu.memory_space<vmem>>, vector<1x1x128xf32>
    %140 = vector.shape_cast %139 : vector<1x1x128xf32> to vector<1x128xf32>
    %141 = vector.broadcast %140 : vector<1x128xf32> to vector<16x128xf32>
    %142 = arith.addf %138, %141 : vector<16x128xf32>
    %143 = arith.mulf %142, %142 : vector<16x128xf32>
    %144 = arith.mulf %142, %143 : vector<16x128xf32>
    %cst_56 = arith.constant 4.471500e-02 : f32
    %145 = vector.broadcast %cst_56 : f32 to vector<16x128xf32>
    %146 = arith.mulf %145, %144 : vector<16x128xf32>
    %147 = arith.addf %142, %146 : vector<16x128xf32>
    %cst_57 = arith.constant 0.797884583 : f32
    %148 = vector.broadcast %cst_57 : f32 to vector<16x128xf32>
    %149 = arith.mulf %148, %147 : vector<16x128xf32>
    %150 = math.tanh %149 : vector<16x128xf32>
    %cst_58 = arith.constant 1.000000e+00 : f32
    %151 = vector.broadcast %cst_58 : f32 to vector<16x128xf32>
    %152 = arith.addf %151, %150 : vector<16x128xf32>
    %cst_59 = arith.constant 5.000000e-01 : f32
    %153 = vector.broadcast %cst_59 : f32 to vector<16x128xf32>
    %154 = arith.mulf %153, %152 : vector<16x128xf32>
    %155 = arith.mulf %142, %154 : vector<16x128xf32>
    %c0_60 = arith.constant 0 : index
    %c0_61 = arith.constant 0 : index
    %c0_62 = arith.constant 0 : index
    %156 = vector.load %arg11[%c0_60, %c0_61, %c0_62] : memref<1x128x32xf32, #tpu.memory_space<vmem>>, vector<1x128x32xf32>
    %157 = vector.shape_cast %156 : vector<1x128x32xf32> to vector<128x32xf32>
    %cst_63 = arith.constant dense<0.000000e+00> : vector<16x32xf32>
    %158 = tpu.matmul %155, %157, %cst_63 {dimension_numbers = #tpu.dot_dimension_numbers<[1], [0], [0], [1], [0, 0, 1, 1], [], []>} : vector<16x128xf32>, vector<128x32xf32>, vector<16x32xf32> -> vector<16x32xf32>
    %c0_64 = arith.constant 0 : index
    %c0_65 = arith.constant 0 : index
    %c0_66 = arith.constant 0 : index
    %159 = vector.load %arg12[%c0_64, %c0_65, %c0_66] : memref<1x1x32xf32, #tpu.memory_space<vmem>>, vector<1x1x32xf32>
    %160 = vector.shape_cast %159 : vector<1x1x32xf32> to vector<1x32xf32>
    %161 = vector.broadcast %160 : vector<1x32xf32> to vector<16x32xf32>
    %162 = arith.addf %158, %161 : vector<16x32xf32>
    %163 = arith.addf %135, %162 : vector<16x32xf32>
    %c0_67 = arith.constant 0 : index
    %c0_68 = arith.constant 0 : index
    %c0_69 = arith.constant 0 : index
    %164 = vector.load %arg13[%c0_67, %c0_68, %c0_69] : memref<1x1x32xf32, #tpu.memory_space<vmem>>, vector<1x1x32xf32>
    %165 = vector.shape_cast %164 : vector<1x1x32xf32> to vector<1x32xf32>
    %c0_70 = arith.constant 0 : index
    %c0_71 = arith.constant 0 : index
    %c0_72 = arith.constant 0 : index
    %166 = vector.load %arg14[%c0_70, %c0_71, %c0_72] : memref<1x1x32xf32, #tpu.memory_space<vmem>>, vector<1x1x32xf32>
    %167 = vector.shape_cast %166 : vector<1x1x32xf32> to vector<1x32xf32>
    %cst_73 = arith.constant dense<0.000000e+00> : vector<16xf32>
    %168 = vector.multi_reduction <add>, %163, %cst_73 [1] : vector<16x32xf32> to vector<16xf32>
    %169 = vector.shape_cast %168 : vector<16xf32> to vector<16x1xf32>
    %cst_74 = arith.constant 3.200000e+01 : f32
    %170 = vector.broadcast %cst_74 : f32 to vector<16x1xf32>
    %171 = arith.divf %169, %170 : vector<16x1xf32>
    %172 = vector.broadcast %171 : vector<16x1xf32> to vector<16x32xf32>
    %173 = arith.subf %163, %172 : vector<16x32xf32>
    %174 = arith.mulf %173, %173 : vector<16x32xf32>
    %cst_75 = arith.constant dense<0.000000e+00> : vector<16xf32>
    %175 = vector.multi_reduction <add>, %174, %cst_75 [1] : vector<16x32xf32> to vector<16xf32>
    %176 = vector.shape_cast %175 : vector<16xf32> to vector<16x1xf32>
    %cst_76 = arith.constant 3.200000e+01 : f32
    %177 = vector.broadcast %cst_76 : f32 to vector<16x1xf32>
    %178 = arith.divf %176, %177 : vector<16x1xf32>
    %179 = vector.broadcast %171 : vector<16x1xf32> to vector<16x32xf32>
    %180 = arith.subf %163, %179 : vector<16x32xf32>
    %cst_77 = arith.constant 9.99999996E-13 : f32
    %181 = vector.broadcast %cst_77 : f32 to vector<16x1xf32>
    %182 = arith.addf %178, %181 : vector<16x1xf32>
    %183 = math.rsqrt %182 : vector<16x1xf32>
    %184 = vector.broadcast %183 : vector<16x1xf32> to vector<16x32xf32>
    %185 = arith.mulf %180, %184 : vector<16x32xf32>
    %186 = vector.broadcast %165 : vector<1x32xf32> to vector<16x32xf32>
    %187 = arith.mulf %185, %186 : vector<16x32xf32>
    %188 = vector.broadcast %167 : vector<1x32xf32> to vector<16x32xf32>
    %189 = arith.addf %187, %188 : vector<16x32xf32>
    %c0_78 = arith.constant 0 : index
    %c0_79 = arith.constant 0 : index
    %190 = vector.load %arg26[%c0_78, %c0_79] : memref<16x32xf32, #tpu.memory_space<vmem>>, vector<16x32xf32>
    tpu.vector_store %arg26[%c0_78, %c0_79], %189 {strides = array<i32>} : memref<16x32xf32, #tpu.memory_space<vmem>>, vector<16x32xf32>,
    %191 = vector.shape_cast %189 : vector<16x32xf32> to vector<2x8x32xf32>
    %192 = vector.extract_strided_slice %191 {offsets = [0, 0, 0], sizes = [2, 1, 32], strides = [1, 1, 1]} : vector<2x8x32xf32> to vector<2x1x32xf32>
    %193 = vector.shape_cast %192 : vector<2x1x32xf32> to vector<2x32xf32>
    %194 = arith.index_cast %arg0 : i32 to index
    %c0_80 = arith.constant 0 : index
    %c0_81 = arith.constant 0 : index
    %195 = vector.load %arg27[%194, %c0_80, %c0_81] : memref<12x2x32xf32, #tpu.memory_space<vmem>>, vector<1x2x32xf32>
    %196 = vector.shape_cast %195 : vector<1x2x32xf32> to vector<2x32xf32>
    %197 = vector.shape_cast %193 : vector<2x32xf32> to vector<1x2x32xf32>
    tpu.vector_store %arg27[%194, %c0_80, %c0_81], %197 {strides = array<i32>} : memref<12x2x32xf32, #tpu.memory_space<vmem>>, vector<1x2x32xf32>,
    %c11_i32 = arith.constant 11 : i32
    %198 = arith.cmpi eq, %arg0, %c11_i32 : i32
    %199 = arith.extui %198 : i1 to i32
    %c0_i32_82 = arith.constant 0 : i32
    %200 = arith.cmpi ne, %199, %c0_i32_82 : i32
    scf.if %200 {
      %c0_83 = arith.constant 0 : index
      %c0_84 = arith.constant 0 : index
      %c0_85 = arith.constant 0 : index
      %201 = vector.load %arg27[%c0_83, %c0_84, %c0_85] : memref<12x2x32xf32, #tpu.memory_space<vmem>>, vector<12x2x32xf32>
      %202 = vector.extract_strided_slice %201 {offsets = [0, 0, 0], sizes = [12, 1, 32], strides = [1, 1, 1]} : vector<12x2x32xf32> to vector<12x1x32xf32>
      %203 = vector.shape_cast %202 : vector<12x1x32xf32> to vector<12x32xf32>
      %204 = vector.extract_strided_slice %203 {offsets = [0, 0], sizes = [11, 32], strides = [1, 1]} : vector<12x32xf32> to vector<11x32xf32>
      %205 = vector.extract_strided_slice %203 {offsets = [1, 0], sizes = [11, 32], strides = [1, 1]} : vector<12x32xf32> to vector<11x32xf32>
      %206 = tpu.concatenate %204, %205 in 1 : vector<11x32xf32>, vector<11x32xf32> -> vector<11x64xf32>
      %c0_86 = arith.constant 0 : index
      %c0_87 = arith.constant 0 : index
      %207 = vector.load %arg15[%c0_86, %c0_87] : memref<64x8xf32, #tpu.memory_space<vmem>>, vector<64x8xf32>
      %cst_88 = arith.constant dense<0.000000e+00> : vector<11x8xf32>
      %208 = tpu.matmul %206, %207, %cst_88 {dimension_numbers = #tpu.dot_dimension_numbers<[1], [0], [0], [1], [0, 0, 1, 1], [], []>} : vector<11x64xf32>, vector<64x8xf32>, vector<11x8xf32> -> vector<11x8xf32>
      %c0_89 = arith.constant 0 : index
      %c0_90 = arith.constant 0 : index
      %209 = vector.load %arg16[%c0_89, %c0_90] : memref<1x8xf32, #tpu.memory_space<vmem>>, vector<1x8xf32>
      %210 = vector.broadcast %209 : vector<1x8xf32> to vector<11x8xf32>
      %211 = arith.addf %208, %210 : vector<11x8xf32>
      %cst_91 = arith.constant 0.000000e+00 : f32
      %212 = vector.broadcast %cst_91 : f32 to vector<11x8xf32>
      %213 = arith.maximumf %211, %212 : vector<11x8xf32>
      %cst_92 = arith.constant dense<0xFF800000> : vector<8xf32>
      %214 = vector.multi_reduction <maximumf>, %213, %cst_92 [0] : vector<11x8xf32> to vector<8xf32>
      %215 = vector.shape_cast %214 : vector<8xf32> to vector<1x8xf32>
      %216 = vector.extract_strided_slice %203 {offsets = [0, 0], sizes = [10, 32], strides = [1, 1]} : vector<12x32xf32> to vector<10x32xf32>
      %217 = vector.extract_strided_slice %203 {offsets = [1, 0], sizes = [10, 32], strides = [1, 1]} : vector<12x32xf32> to vector<10x32xf32>
      %218 = vector.extract_strided_slice %203 {offsets = [2, 0], sizes = [10, 32], strides = [1, 1]} : vector<12x32xf32> to vector<10x32xf32>
      %219 = tpu.concatenate %216, %217, %218 in 1 : vector<10x32xf32>, vector<10x32xf32>, vector<10x32xf32> -> vector<10x96xf32>
      %c0_93 = arith.constant 0 : index
      %c0_94 = arith.constant 0 : index
      %220 = vector.load %arg17[%c0_93, %c0_94] : memref<96x8xf32, #tpu.memory_space<vmem>>, vector<96x8xf32>
      %cst_95 = arith.constant dense<0.000000e+00> : vector<10x8xf32>
      %221 = tpu.matmul %219, %220, %cst_95 {dimension_numbers = #tpu.dot_dimension_numbers<[1], [0], [0], [1], [0, 0, 1, 1], [], []>} : vector<10x96xf32>, vector<96x8xf32>, vector<10x8xf32> -> vector<10x8xf32>
      %c0_96 = arith.constant 0 : index
      %c0_97 = arith.constant 0 : index
      %222 = vector.load %arg18[%c0_96, %c0_97] : memref<1x8xf32, #tpu.memory_space<vmem>>, vector<1x8xf32>
      %223 = vector.broadcast %222 : vector<1x8xf32> to vector<10x8xf32>
      %224 = arith.addf %221, %223 : vector<10x8xf32>
      %cst_98 = arith.constant 0.000000e+00 : f32
      %225 = vector.broadcast %cst_98 : f32 to vector<10x8xf32>
      %226 = arith.maximumf %224, %225 : vector<10x8xf32>
      %cst_99 = arith.constant dense<0xFF800000> : vector<8xf32>
      %227 = vector.multi_reduction <maximumf>, %226, %cst_99 [0] : vector<10x8xf32> to vector<8xf32>
      %228 = vector.shape_cast %227 : vector<8xf32> to vector<1x8xf32>
      %229 = vector.extract_strided_slice %203 {offsets = [0, 0], sizes = [9, 32], strides = [1, 1]} : vector<12x32xf32> to vector<9x32xf32>
      %230 = vector.extract_strided_slice %203 {offsets = [1, 0], sizes = [9, 32], strides = [1, 1]} : vector<12x32xf32> to vector<9x32xf32>
      %231 = vector.extract_strided_slice %203 {offsets = [2, 0], sizes = [9, 32], strides = [1, 1]} : vector<12x32xf32> to vector<9x32xf32>
      %232 = vector.extract_strided_slice %203 {offsets = [3, 0], sizes = [9, 32], strides = [1, 1]} : vector<12x32xf32> to vector<9x32xf32>
      %233 = tpu.concatenate %229, %230, %231, %232 in 1 : vector<9x32xf32>, vector<9x32xf32>, vector<9x32xf32>, vector<9x32xf32> -> vector<9x128xf32>
      %c0_100 = arith.constant 0 : index
      %c0_101 = arith.constant 0 : index
      %234 = vector.load %arg19[%c0_100, %c0_101] : memref<128x8xf32, #tpu.memory_space<vmem>>, vector<128x8xf32>
      %cst_102 = arith.constant dense<0.000000e+00> : vector<9x8xf32>
      %235 = tpu.matmul %233, %234, %cst_102 {dimension_numbers = #tpu.dot_dimension_numbers<[1], [0], [0], [1], [0, 0, 1, 1], [], []>} : vector<9x128xf32>, vector<128x8xf32>, vector<9x8xf32> -> vector<9x8xf32>
      %c0_103 = arith.constant 0 : index
      %c0_104 = arith.constant 0 : index
      %236 = vector.load %arg20[%c0_103, %c0_104] : memref<1x8xf32, #tpu.memory_space<vmem>>, vector<1x8xf32>
      %237 = vector.broadcast %236 : vector<1x8xf32> to vector<9x8xf32>
      %238 = arith.addf %235, %237 : vector<9x8xf32>
      %cst_105 = arith.constant 0.000000e+00 : f32
      %239 = vector.broadcast %cst_105 : f32 to vector<9x8xf32>
      %240 = arith.maximumf %238, %239 : vector<9x8xf32>
      %cst_106 = arith.constant dense<0xFF800000> : vector<8xf32>
      %241 = vector.multi_reduction <maximumf>, %240, %cst_106 [0] : vector<9x8xf32> to vector<8xf32>
      %242 = vector.shape_cast %241 : vector<8xf32> to vector<1x8xf32>
      %243 = tpu.concatenate %215, %228, %242 in 1 : vector<1x8xf32>, vector<1x8xf32>, vector<1x8xf32> -> vector<1x24xf32>
      %244 = vector.extract_strided_slice %201 {offsets = [0, 1, 0], sizes = [12, 1, 32], strides = [1, 1, 1]} : vector<12x2x32xf32> to vector<12x1x32xf32>
      %245 = vector.shape_cast %244 : vector<12x1x32xf32> to vector<12x32xf32>
      %246 = vector.extract_strided_slice %245 {offsets = [0, 0], sizes = [11, 32], strides = [1, 1]} : vector<12x32xf32> to vector<11x32xf32>
      %247 = vector.extract_strided_slice %245 {offsets = [1, 0], sizes = [11, 32], strides = [1, 1]} : vector<12x32xf32> to vector<11x32xf32>
      %248 = tpu.concatenate %246, %247 in 1 : vector<11x32xf32>, vector<11x32xf32> -> vector<11x64xf32>
      %c0_107 = arith.constant 0 : index
      %c0_108 = arith.constant 0 : index
      %249 = vector.load %arg15[%c0_107, %c0_108] : memref<64x8xf32, #tpu.memory_space<vmem>>, vector<64x8xf32>
      %cst_109 = arith.constant dense<0.000000e+00> : vector<11x8xf32>
      %250 = tpu.matmul %248, %249, %cst_109 {dimension_numbers = #tpu.dot_dimension_numbers<[1], [0], [0], [1], [0, 0, 1, 1], [], []>} : vector<11x64xf32>, vector<64x8xf32>, vector<11x8xf32> -> vector<11x8xf32>
      %c0_110 = arith.constant 0 : index
      %c0_111 = arith.constant 0 : index
      %251 = vector.load %arg16[%c0_110, %c0_111] : memref<1x8xf32, #tpu.memory_space<vmem>>, vector<1x8xf32>
      %252 = vector.broadcast %251 : vector<1x8xf32> to vector<11x8xf32>
      %253 = arith.addf %250, %252 : vector<11x8xf32>
      %cst_112 = arith.constant 0.000000e+00 : f32
      %254 = vector.broadcast %cst_112 : f32 to vector<11x8xf32>
      %255 = arith.maximumf %253, %254 : vector<11x8xf32>
      %cst_113 = arith.constant dense<0xFF800000> : vector<8xf32>
      %256 = vector.multi_reduction <maximumf>, %255, %cst_113 [0] : vector<11x8xf32> to vector<8xf32>
      %257 = vector.shape_cast %256 : vector<8xf32> to vector<1x8xf32>
      %258 = vector.extract_strided_slice %245 {offsets = [0, 0], sizes = [10, 32], strides = [1, 1]} : vector<12x32xf32> to vector<10x32xf32>
      %259 = vector.extract_strided_slice %245 {offsets = [1, 0], sizes = [10, 32], strides = [1, 1]} : vector<12x32xf32> to vector<10x32xf32>
      %260 = vector.extract_strided_slice %245 {offsets = [2, 0], sizes = [10, 32], strides = [1, 1]} : vector<12x32xf32> to vector<10x32xf32>
      %261 = tpu.concatenate %258, %259, %260 in 1 : vector<10x32xf32>, vector<10x32xf32>, vector<10x32xf32> -> vector<10x96xf32>
      %c0_114 = arith.constant 0 : index
      %c0_115 = arith.constant 0 : index
      %262 = vector.load %arg17[%c0_114, %c0_115] : memref<96x8xf32, #tpu.memory_space<vmem>>, vector<96x8xf32>
      %cst_116 = arith.constant dense<0.000000e+00> : vector<10x8xf32>
      %263 = tpu.matmul %261, %262, %cst_116 {dimension_numbers = #tpu.dot_dimension_numbers<[1], [0], [0], [1], [0, 0, 1, 1], [], []>} : vector<10x96xf32>, vector<96x8xf32>, vector<10x8xf32> -> vector<10x8xf32>
      %c0_117 = arith.constant 0 : index
      %c0_118 = arith.constant 0 : index
      %264 = vector.load %arg18[%c0_117, %c0_118] : memref<1x8xf32, #tpu.memory_space<vmem>>, vector<1x8xf32>
      %265 = vector.broadcast %264 : vector<1x8xf32> to vector<10x8xf32>
      %266 = arith.addf %263, %265 : vector<10x8xf32>
      %cst_119 = arith.constant 0.000000e+00 : f32
      %267 = vector.broadcast %cst_119 : f32 to vector<10x8xf32>
      %268 = arith.maximumf %266, %267 : vector<10x8xf32>
      %cst_120 = arith.constant dense<0xFF800000> : vector<8xf32>
      %269 = vector.multi_reduction <maximumf>, %268, %cst_120 [0] : vector<10x8xf32> to vector<8xf32>
      %270 = vector.shape_cast %269 : vector<8xf32> to vector<1x8xf32>
      %271 = vector.extract_strided_slice %245 {offsets = [0, 0], sizes = [9, 32], strides = [1, 1]} : vector<12x32xf32> to vector<9x32xf32>
      %272 = vector.extract_strided_slice %245 {offsets = [1, 0], sizes = [9, 32], strides = [1, 1]} : vector<12x32xf32> to vector<9x32xf32>
      %273 = vector.extract_strided_slice %245 {offsets = [2, 0], sizes = [9, 32], strides = [1, 1]} : vector<12x32xf32> to vector<9x32xf32>
      %274 = vector.extract_strided_slice %245 {offsets = [3, 0], sizes = [9, 32], strides = [1, 1]} : vector<12x32xf32> to vector<9x32xf32>
      %275 = tpu.concatenate %271, %272, %273, %274 in 1 : vector<9x32xf32>, vector<9x32xf32>, vector<9x32xf32>, vector<9x32xf32> -> vector<9x128xf32>
      %c0_121 = arith.constant 0 : index
      %c0_122 = arith.constant 0 : index
      %276 = vector.load %arg19[%c0_121, %c0_122] : memref<128x8xf32, #tpu.memory_space<vmem>>, vector<128x8xf32>
      %cst_123 = arith.constant dense<0.000000e+00> : vector<9x8xf32>
      %277 = tpu.matmul %275, %276, %cst_123 {dimension_numbers = #tpu.dot_dimension_numbers<[1], [0], [0], [1], [0, 0, 1, 1], [], []>} : vector<9x128xf32>, vector<128x8xf32>, vector<9x8xf32> -> vector<9x8xf32>
      %c0_124 = arith.constant 0 : index
      %c0_125 = arith.constant 0 : index
      %278 = vector.load %arg20[%c0_124, %c0_125] : memref<1x8xf32, #tpu.memory_space<vmem>>, vector<1x8xf32>
      %279 = vector.broadcast %278 : vector<1x8xf32> to vector<9x8xf32>
      %280 = arith.addf %277, %279 : vector<9x8xf32>
      %cst_126 = arith.constant 0.000000e+00 : f32
      %281 = vector.broadcast %cst_126 : f32 to vector<9x8xf32>
      %282 = arith.maximumf %280, %281 : vector<9x8xf32>
      %cst_127 = arith.constant dense<0xFF800000> : vector<8xf32>
      %283 = vector.multi_reduction <maximumf>, %282, %cst_127 [0] : vector<9x8xf32> to vector<8xf32>
      %284 = vector.shape_cast %283 : vector<8xf32> to vector<1x8xf32>
      %285 = tpu.concatenate %257, %270, %284 in 1 : vector<1x8xf32>, vector<1x8xf32>, vector<1x8xf32> -> vector<1x24xf32>
      %286 = tpu.concatenate %243, %285 in 0 : vector<1x24xf32>, vector<1x24xf32> -> vector<2x24xf32>
      %c0_128 = arith.constant 0 : index
      %c0_129 = arith.constant 0 : index
      %287 = vector.load %arg21[%c0_128, %c0_129] : memref<24x7xf32, #tpu.memory_space<vmem>>, vector<24x7xf32>
      %cst_130 = arith.constant dense<0.000000e+00> : vector<2x7xf32>
      %288 = tpu.matmul %286, %287, %cst_130 {dimension_numbers = #tpu.dot_dimension_numbers<[1], [0], [0], [1], [0, 0, 1, 1], [], []>} : vector<2x24xf32>, vector<24x7xf32>, vector<2x7xf32> -> vector<2x7xf32>
      %c0_131 = arith.constant 0 : index
      %c0_132 = arith.constant 0 : index
      %289 = vector.load %arg22[%c0_131, %c0_132] : memref<1x7xf32, #tpu.memory_space<vmem>>, vector<1x7xf32>
      %290 = vector.broadcast %289 : vector<1x7xf32> to vector<2x7xf32>
      %291 = arith.addf %288, %290 : vector<2x7xf32>
      %c0_133 = arith.constant 0 : index
      %c0_134 = arith.constant 0 : index
      %292 = vector.load %arg24[%c0_133, %c0_134] : memref<2x7xf32, #tpu.memory_space<vmem>>, vector<2x7xf32>
      tpu.vector_store %arg24[%c0_133, %c0_134], %291 {strides = array<i32>} : memref<2x7xf32, #tpu.memory_space<vmem>>, vector<2x7xf32>,
      %c0_135 = arith.constant 0 : index
      %c0_136 = arith.constant 0 : index
      %293 = vector.load %arg23[%c0_135, %c0_136] : memref<2x7xf32, #tpu.memory_space<vmem>>, vector<2x7xf32>
      %cst_137 = arith.constant dense<0xFF800000> : vector<2xf32>
      %294 = vector.multi_reduction <maximumf>, %291, %cst_137 [1] : vector<2x7xf32> to vector<2xf32>
      %295 = vector.shape_cast %294 : vector<2xf32> to vector<2x1xf32>
      %296 = vector.broadcast %295 : vector<2x1xf32> to vector<2x7xf32>
      %297 = arith.subf %291, %296 : vector<2x7xf32>
      %298 = math.exp %297 : vector<2x7xf32>
      %cst_138 = arith.constant dense<0.000000e+00> : vector<2xf32>
      %299 = vector.multi_reduction <add>, %298, %cst_138 [1] : vector<2x7xf32> to vector<2xf32>
      %300 = vector.shape_cast %299 : vector<2xf32> to vector<2x1xf32>
      %301 = math.log %300 : vector<2x1xf32>
      %302 = arith.addf %295, %301 : vector<2x1xf32>
      %303 = arith.mulf %291, %293 : vector<2x7xf32>
      %cst_139 = arith.constant dense<0.000000e+00> : vector<2xf32>
      %304 = vector.multi_reduction <add>, %303, %cst_139 [1] : vector<2x7xf32> to vector<2xf32>
      %305 = vector.shape_cast %304 : vector<2xf32> to vector<2x1xf32>
      %306 = arith.subf %302, %305 : vector<2x1xf32>
      %cst_140 = arith.constant dense<0.000000e+00> : vector<1xf32>
      %307 = vector.multi_reduction <add>, %306, %cst_140 [0] : vector<2x1xf32> to vector<1xf32>
      %308 = vector.shape_cast %307 : vector<1xf32> to vector<1x1xf32>
      %cst_141 = arith.constant 5.000000e-01 : f32
      %309 = vector.broadcast %cst_141 : f32 to vector<1x1xf32>
      %310 = arith.mulf %308, %309 : vector<1x1xf32>
      %c0_142 = arith.constant 0 : index
      %c0_143 = arith.constant 0 : index
      %311 = vector.load %arg25[%c0_142, %c0_143] : memref<1x1xf32, #tpu.memory_space<vmem>>, vector<1x1xf32>
      tpu.vector_store %arg25[%c0_142, %c0_143], %310 {strides = array<i32>} : memref<1x1xf32, #tpu.memory_space<vmem>>, vector<1x1xf32>,
    } else {
    }
    return
  }
  func.func @transform_0(%arg0: i32) -> (i32, i32) {
    %c0_i32 = arith.constant 0 : i32
    %c0_i32_0 = arith.constant 0 : i32
    %c0_i32_1 = arith.constant 0 : i32
    return %c0_i32, %c0_i32_0 : i32, i32
  }
  func.func @transform_1(%arg0: i32) -> (i32, i32, i32) {
    %c0_i32 = arith.constant 0 : i32
    %c0_i32_0 = arith.constant 0 : i32
    %c0_i32_1 = arith.constant 0 : i32
    %c0_i32_2 = arith.constant 0 : i32
    return %c0_i32, %c0_i32_0, %c0_i32_1 : i32, i32, i32
  }
  func.func @transform_2(%arg0: i32) -> (i32, i32, i32) {
    %c0_i32 = arith.constant 0 : i32
    %c0_i32_0 = arith.constant 0 : i32
    %c0_i32_1 = arith.constant 0 : i32
    return %arg0, %c0_i32, %c0_i32_0 : i32, i32, i32
  }
  func.func @transform_3(%arg0: i32) -> (i32, i32, i32) {
    %c0_i32 = arith.constant 0 : i32
    %c0_i32_0 = arith.constant 0 : i32
    %c0_i32_1 = arith.constant 0 : i32
    return %arg0, %c0_i32, %c0_i32_0 : i32, i32, i32
  }
  func.func @transform_4(%arg0: i32) -> (i32, i32, i32) {
    %c0_i32 = arith.constant 0 : i32
    %c0_i32_0 = arith.constant 0 : i32
    %c0_i32_1 = arith.constant 0 : i32
    return %arg0, %c0_i32, %c0_i32_0 : i32, i32, i32
  }
  func.func @transform_5(%arg0: i32) -> (i32, i32, i32) {
    %c0_i32 = arith.constant 0 : i32
    %c0_i32_0 = arith.constant 0 : i32
    %c0_i32_1 = arith.constant 0 : i32
    return %arg0, %c0_i32, %c0_i32_0 : i32, i32, i32
  }
  func.func @transform_6(%arg0: i32) -> (i32, i32, i32) {
    %c0_i32 = arith.constant 0 : i32
    %c0_i32_0 = arith.constant 0 : i32
    %c0_i32_1 = arith.constant 0 : i32
    return %arg0, %c0_i32, %c0_i32_0 : i32, i32, i32
  }
  func.func @transform_7(%arg0: i32) -> (i32, i32, i32) {
    %c0_i32 = arith.constant 0 : i32
    %c0_i32_0 = arith.constant 0 : i32
    %c0_i32_1 = arith.constant 0 : i32
    return %arg0, %c0_i32, %c0_i32_0 : i32, i32, i32
  }
  func.func @transform_8(%arg0: i32) -> (i32, i32, i32) {
    %c0_i32 = arith.constant 0 : i32
    %c0_i32_0 = arith.constant 0 : i32
    %c0_i32_1 = arith.constant 0 : i32
    return %arg0, %c0_i32, %c0_i32_0 : i32, i32, i32
  }
  func.func @transform_9(%arg0: i32) -> (i32, i32, i32) {
    %c0_i32 = arith.constant 0 : i32
    %c0_i32_0 = arith.constant 0 : i32
    %c0_i32_1 = arith.constant 0 : i32
    return %arg0, %c0_i32, %c0_i32_0 : i32, i32, i32
  }
  func.func @transform_10(%arg0: i32) -> (i32, i32, i32) {
    %c0_i32 = arith.constant 0 : i32
    %c0_i32_0 = arith.constant 0 : i32
    %c0_i32_1 = arith.constant 0 : i32
    return %arg0, %c0_i32, %c0_i32_0 : i32, i32, i32
  }
  func.func @transform_11(%arg0: i32) -> (i32, i32, i32) {
    %c0_i32 = arith.constant 0 : i32
    %c0_i32_0 = arith.constant 0 : i32
    %c0_i32_1 = arith.constant 0 : i32
    return %arg0, %c0_i32, %c0_i32_0 : i32, i32, i32
  }
  func.func @transform_12(%arg0: i32) -> (i32, i32, i32) {
    %c0_i32 = arith.constant 0 : i32
    %c0_i32_0 = arith.constant 0 : i32
    %c0_i32_1 = arith.constant 0 : i32
    return %arg0, %c0_i32, %c0_i32_0 : i32, i32, i32
  }
  func.func @transform_13(%arg0: i32) -> (i32, i32, i32) {
    %c0_i32 = arith.constant 0 : i32
    %c0_i32_0 = arith.constant 0 : i32
    %c0_i32_1 = arith.constant 0 : i32
    return %arg0, %c0_i32, %c0_i32_0 : i32, i32, i32
  }
  func.func @transform_14(%arg0: i32) -> (i32, i32) {
    %c0_i32 = arith.constant 0 : i32
    %c0_i32_0 = arith.constant 0 : i32
    %c0_i32_1 = arith.constant 0 : i32
    return %c0_i32, %c0_i32_0 : i32, i32
  }
  func.func @transform_15(%arg0: i32) -> (i32, i32) {
    %c0_i32 = arith.constant 0 : i32
    %c0_i32_0 = arith.constant 0 : i32
    %c0_i32_1 = arith.constant 0 : i32
    return %c0_i32, %c0_i32_0 : i32, i32
  }
  func.func @transform_16(%arg0: i32) -> (i32, i32) {
    %c0_i32 = arith.constant 0 : i32
    %c0_i32_0 = arith.constant 0 : i32
    %c0_i32_1 = arith.constant 0 : i32
    return %c0_i32, %c0_i32_0 : i32, i32
  }
  func.func @transform_17(%arg0: i32) -> (i32, i32) {
    %c0_i32 = arith.constant 0 : i32
    %c0_i32_0 = arith.constant 0 : i32
    %c0_i32_1 = arith.constant 0 : i32
    return %c0_i32, %c0_i32_0 : i32, i32
  }
  func.func @transform_18(%arg0: i32) -> (i32, i32) {
    %c0_i32 = arith.constant 0 : i32
    %c0_i32_0 = arith.constant 0 : i32
    %c0_i32_1 = arith.constant 0 : i32
    return %c0_i32, %c0_i32_0 : i32, i32
  }
  func.func @transform_19(%arg0: i32) -> (i32, i32) {
    %c0_i32 = arith.constant 0 : i32
    %c0_i32_0 = arith.constant 0 : i32
    %c0_i32_1 = arith.constant 0 : i32
    return %c0_i32, %c0_i32_0 : i32, i32
  }
  func.func @transform_20(%arg0: i32) -> (i32, i32) {
    %c0_i32 = arith.constant 0 : i32
    %c0_i32_0 = arith.constant 0 : i32
    %c0_i32_1 = arith.constant 0 : i32
    return %c0_i32, %c0_i32_0 : i32, i32
  }
  func.func @transform_21(%arg0: i32) -> (i32, i32) {
    %c0_i32 = arith.constant 0 : i32
    %c0_i32_0 = arith.constant 0 : i32
    %c0_i32_1 = arith.constant 0 : i32
    return %c0_i32, %c0_i32_0 : i32, i32
  }
  func.func @transform_22(%arg0: i32) -> (i32, i32) {
    %c0_i32 = arith.constant 0 : i32
    %c0_i32_0 = arith.constant 0 : i32
    %c0_i32_1 = arith.constant 0 : i32
    return %c0_i32, %c0_i32_0 : i32, i32
  }
  func.func @transform_23(%arg0: i32) -> (i32, i32) {
    %c0_i32 = arith.constant 0 : i32
    %c0_i32_0 = arith.constant 0 : i32
    %c0_i32_1 = arith.constant 0 : i32
    return %c0_i32, %c0_i32_0 : i32, i32
  }
  func.func @transform_24(%arg0: i32) -> (i32, i32) {
    %c0_i32 = arith.constant 0 : i32
    %c0_i32_0 = arith.constant 0 : i32
    %c0_i32_1 = arith.constant 0 : i32
    return %c0_i32, %c0_i32_0 : i32, i32
  }
}

</mosaic_0001>

<bundles_post_ra>
// kernel: bert_textcnn_forward.1
= control target key start
LH: loop header
LB: loop body
LE: loop exit
PB: predicated region body
PF: predicated region fallthrough
CT: control target
= control target key end

     0   :  { %s5905_s0 = inlined_call_operand.vmem [shape: f32[16,32], index: 0, kind: input, shape index: {}]   ;;  %s5906_s1 = inlined_call_operand.vmem [shape: f32[2,1,8], index: 1, kind: input, shape index: {}]   ;;  %s5907_s2 = inlined_call_operand.vmem [shape: f32[12,32,96], index: 2, kind: input, shape index: {}]   ;;  %s5908_s3 = inlined_call_operand.vmem [shape: f32[12,1,96], index: 3, kind: input, shape index: {}]   ;;  %s5909_s4 = inlined_call_operand.vmem [shape: f32[12,32,32], index: 4, kind: input, shape index: {}]   ;;  %s5910_s5 = inlined_call_operand.vmem [shape: f32[12,1,32], index: 5, kind: input, shape index: {}]   ;;  %s5911_s6 = inlined_call_operand.vmem [shape: f32[12,1,32], index: 6, kind: input, shape index: {}]   ;;  %s5912_s7 = inlined_call_operand.vmem [shape: f32[12,1,32], index: 7, kind: input, shape index: {}]   ;;  %s5913_s8 = inlined_call_operand.vmem [shape: f32[12,32,128], index: 8, kind: input, shape index: {}]   ;;  %s5914_s9 = inlined_call_operand.vmem [shape: f32[12,1,128], index: 9, kind: input, shape index: {}]   ;;  %s5915_s10 = inlined_call_operand.vmem [shape: f32[12,128,32], index: 10, kind: input, shape index: {}]   ;;  %s5916_s11 = inlined_call_operand.vmem [shape: f32[12,1,32], index: 11, kind: input, shape index: {}]   ;;  %s5917_s12 = inlined_call_operand.vmem [shape: f32[12,1,32], index: 12, kind: input, shape index: {}]   ;;  %s5918_s13 = inlined_call_operand.vmem [shape: f32[12,1,32], index: 13, kind: input, shape index: {}]   ;;  %s5919_s14 = inlined_call_operand.vmem [shape: f32[64,8], index: 14, kind: input, shape index: {}]   ;;  %s5920_s15 = inlined_call_operand.vmem [shape: f32[1,8], index: 15, kind: input, shape index: {}]   ;;  %s5921_s16 = inlined_call_operand.vmem [shape: f32[96,8], index: 16, kind: input, shape index: {}]   ;;  %s5922_s17 = inlined_call_operand.vmem [shape: f32[1,8], index: 17, kind: input, shape index: {}]   ;;  %s5923_s18 = inlined_call_operand.vmem [shape: f32[128,8], index: 18, kind: input, shape index: {}]   ;;  %s5924_s19 = inlined_call_operand.vmem [shape: f32[1,8], index: 19, kind: input, shape index: {}]   ;;  %s5925_s20 = inlined_call_operand.vmem [shape: f32[24,7], index: 20, kind: input, shape index: {}]   ;;  %s5926_s21 = inlined_call_operand.vmem [shape: f32[1,7], index: 21, kind: input, shape index: {}]   ;;  %s5927_s22 = inlined_call_operand.vmem [shape: f32[2,7], index: 22, kind: input, shape index: {}]   ;;  %s5928_s23 = inlined_call_operand.hbm [shape: f32[2,7], index: 23, kind: output, shape index: {0}]   ;;  %s5929_s24 = inlined_call_operand.hbm [shape: f32[1,1], index: 24, kind: output, shape index: {1}]  }
   0x1   :  { %5938 = sst [smem:[#allocation11_spill]] %s5905_s0 }
   0x2   :  { %5939 = sst [smem:[#allocation12_spill]] %s5906_s1 }
   0x3   :  { %5940 = sst [smem:[#allocation13_spill]] %s5907_s2 }
   0x4   :  { %5941 = sst [smem:[#allocation14_spill]] %s5908_s3 }
   0x5   :  { %5942 = sst [smem:[#allocation15_spill]] %s5909_s4 }
   0x6   :  { %5943 = sst [smem:[#allocation16_spill]] %s5910_s5 }
   0x7   :  { %5944 = sst [smem:[#allocation17_spill]] %s5911_s6 }
   0x8   :  { %5945 = sst [smem:[#allocation18_spill]] %s5912_s7 }
   0x9   :  { %5946 = sst [smem:[#allocation19_spill]] %s5913_s8 }
   0xa   :  { %5947 = sst [smem:[#allocation20_spill]] %s5919_s14 }
   0xb   :  { %5948 = sst [smem:[#allocation21_spill]] %s5920_s15 }
   0xc   :  { %5949 = sst [smem:[#allocation22_spill]] %s5922_s17 }
   0xd   :  { %5950 = sst [smem:[#allocation23_spill]] %s5923_s18 }
   0xe   :  { %5951 = sst [smem:[#allocation24_spill]] %s5924_s19 }
   0xf   :  { %5952 = sst [smem:[#allocation25_spill]] %s5925_s20 }
  0x10   :  { %5953 = sst [smem:[#allocation26_spill]] %s5926_s21 }
  0x11   :  { %5954 = sst [smem:[#allocation27_spill]] %s5927_s22 }
  0x12   :  { %5955 = sst [smem:[#allocation28_spill]] %s5928_s23 }
  0x13   :  { %5956 = sst [smem:[#allocation29_spill]] %s5929_s24 }
  0x14   :  { %30 = vsyncpa [#allocation5], 0 }
  0x15   :  { %31 = vsyncpa [#allocation7], 0  ;;  %s5010_s5 = smov 0  }
  0x16 LB: > { %5957 = sst [smem:[#allocation10_spill]] %s4857_s5  ;;  %s5016_s26 = sadd.s32 4294967295, %s4857_s5   ;;  %s4857_s5 = sphi %s5010_s5, %s37_s5  }
  0x17   : > { %p3934_p0 = scmp.ge.s32.totalorder %s4857_s5, 1  ;;  %p751_p1 = scmp.lt.s32.totalorder %s4857_s5, 13 }
  0x19   : > { %p752_p2 = pnand %p3934_p0, %p751_p1 }
  0x1a   : > { %p851_p3 = scmp.lt.s32.totalorder (!%p752_p2), %s5016_s26, 11  ;;  %s5959_s3 = sld [smem:[#allocation13_spill]] (!%p752_p2) }
  0x1b   : > { %755 = sbr.rel (%p752_p2) target bundleno = 5331 (0x14d3), region = 112  ;;  %s5960_s1 = sld [smem:[#allocation15_spill]] (!%p752_p2) }
  0x1c   : > { %s5961_s22 = sld [smem:[#allocation16_spill]] (!%p752_p2)  ;;  %s5962_s17 = sld [smem:[#allocation17_spill]] (!%p752_p2) }
  0x1d   : > { %s5963_s2 = sld [smem:[#allocation18_spill]] (!%p752_p2)  ;;  %s5964_s30 = sld [smem:[#allocation19_spill]] (!%p752_p2) }
  0x1e   : > { %p3943_p4 = scmp.ne.s32.totalorder (!%p752_p2), %s5016_s26, 0 }
  0x22   : > { %s5022_s27 = scalar_select %p851_p3, %s5016_s26, 11 }
  0x23   : > { %s5965_s4 = sld [smem:[#allocation11_spill]] (!%p3943_p4)  ;;  %vm901_vm0 = vcmask (!%p3943_p4), 261120  }
  0x24   : > { %s4005_s28 = sshll.u32 %s5022_s27, 5  ;;  %s866_s21 = scalar_lea.vmem %s5961_s22, %s5022_s27 }
  0x25   : > { %s855_s25 = scalar_lea.vmem %s5959_s3, %s4005_s28  ;;  %s5035_s5 = scalar_lea.vmem %s5960_s1, %s4005_s28 }
  0x26   : > { %s869_s15 = scalar_lea.vmem %s5962_s17, %s5022_s27  ;;  %s872_s29 = scalar_lea.vmem %s5963_s2, %s5022_s27 }
  0x27   : > { %s5052_s3 = scalar_lea.vmem %s5964_s30, %s4005_s28  ;;  %s880_s1 = scalar_lea.vmem %s5914_s9, %s5022_s27 }
  0x28   : > { %s4008_s14 = sshll.u32 %s5022_s27, 7  ;;  %s888_s18 = scalar_lea.vmem %s5916_s11, %s5022_s27 }
  0x29   : > { %s5062_s24 = scalar_lea.vmem %s5915_s10, %s4008_s14  ;;  %s891_s0 = scalar_lea.vmem %s5917_s12, %s5022_s27  ;;  %v899_v0 = vld [vmem:[%s5965_s4] sm:$0xff] (!%p3943_p4)  ;;  %v900_v1 = vld [vmem:[%s5965_s4 + $0x8] sm:$0xff] (!%p3943_p4) }
  0x2a   : > { %s894_s7 = scalar_lea.vmem %s5918_s13, %s5022_s27  ;;  %898 = sbr.rel (%p3943_p4) target bundleno = 49 (0x31), region = 116  ;;  %902 = vst.msk [vmem:[#allocation2] sm:$0xff] (!%p3943_p4), %vm901_vm0, %v899_v0  ;;  %903 = vst.msk [vmem:[#allocation2 + $0x8] sm:$0xff] (!%p3943_p4), %vm901_vm0, %v900_v1 }
  0x31 PF: > { %v908_v2 = vld [vmem:[%s855_s25] sm:$0xff]  ;;  %v909_v3 = vld [vmem:[%s855_s25 + $0x8] sm:$0xff]  ;;  %v910_v4 = vld [vmem:[%s855_s25 + $0x10] sm:$0xff]  ;;  %vm919_vm1 = vcmask 261120   ;;  %v4859_v10 = vmov 0.0   ;;  %vm4860_vm2 = vmmov 0  }
  0x32   : > { %v4484_v5 = vpack.c.bf16 %v909_v3, %v908_v2  ;;  %v911_v6 = vld [vmem:[%s855_s25 + $0x18] sm:$0xff]  ;;  %v5083_v7 = vld [vmem:[#allocation2] sm:$0xff]  ;;  %v5087_v9 = vld [vmem:[#allocation2 + $0x8] sm:$0xff]  ;;  %4186 = vmatprep.subr.mxu0 %v4859_v10  ;;  %4188 = vmatprep.mubr.msk.f32.mxu0 %vm4860_vm2, %v4859_v10  ;;  %s5966_s17 = sld [smem:[#allocation14_spill]]  ;;  %s4861_s20 = smov 96   ;;  %vm1004_vm3 = vcmask 64512  }
  0x33   : > { %v4488_v8 = vpack.c.bf16 %v911_v6, %v910_v4  ;;  %4173 = vmatprep.mubr.msk.f32.mxu1 %vm919_vm1, %v5083_v7  ;;  %s5968_s2 = sld [smem:[#allocation12_spill]]  ;;  %s4862_s14 = smov 64   ;;  %vm2377_vm4 = vcmask 195584   ;;  %vm2374_vm5 = vcmask 130048   ;;  %vm2778_vm6 = vcmask 1041409  }
  0x34   : > { %4485 = vmatprep.subr.bf16.mxu1 %v4484_v5  ;;  %s4863_s23 = smov 88   ;;  %s4864_s25 = smov 120   ;;  %vm2783_vm7 = vcmask 254976  }
  0x35   : > { %4487 = vmatpush3.bf16.msra.mxu1 %v4484_v5  ;;  %s4865_s22 = smov 56   ;;  %s4869_s6 = smov 72  }
  0x36   : > { %4489 = vmatprep.subr.bf16.mxu1 %v4488_v8  ;;  %s4870_s28 = smov 104   ;;  %s4871_s30 = smov 40  }
  0x37   : > { %s4872_s8 = smov 8   ;;  %p3985_p5 = scmp.ne.s32.totalorder %s5016_s26, 11 }
  0x38   : > { %s5967_s19 = scalar_lea.vmem %s5966_s17, %s5022_s27  ;;  %s4866_s17 = smov 80   ;;  %vm2815_vm8 = vcmask (!%p3985_p5), 1042434   ;;  %vm2818_vm9 = vcmask (!%p3985_p5), 1043459   ;;  %vm2821_vm10 = vcmask (!%p3985_p5), 1044484   ;;  %vm2824_vm11 = vcmask (!%p3985_p5), 1045509  }
  0x39   : > { %4491 = vmatpush3.bf16.msra.mxu1 %v4488_v8  ;;  %v3944_v11 = vld [vmem:[%s5967_s19] ss:$0 sm:$0xff]  ;;  %v5129_v24 = vld [vmem:[%s5968_s2 + $0x1] ss:$0 sm:$0xff]  ;;  %s4867_s19 = smov 112   ;;  %s4875_s27 = smov (!%p3985_p5), 32  }
  0x3a   : > { %4176 = vmatprep.subr.mxu1 %v4859_v10  ;;  %v5123_v19 = vld [vmem:[%s5968_s2] ss:$0 sm:$0xff]  ;;  %vm2827_vm12 = vcmask (!%p3985_p5), 1046534   ;;  %vm2830_vm13 = vcmask (!%p3985_p5), 1047559   ;;  %vm2880_vm14 = vcmask (!%p3985_p5), 523264   ;;  %vm3022_vm15 = vcmask (!%p3985_p5), 785408  }
  0x3b   : > { %vm3297_vm0 = vcmask (!%p3985_p5), 1046528  }
  0x3c   : > { %4174 = vmatmul.mubr.msk.f32.vlgmr.msra.gmra.mrb[0].mxu1 %vm919_vm1, %v5087_v9 }
  0x3d   : > { %4178 = vmatprep.mubr.msk.f32.mxu1 %vm4860_vm2, %v4859_v10 }
 0x10f   : > { %v4175_v12 = vpop.f32.mrb[0].mxu1 }
 0x110   : > { %v992_v13 = vpop.f32.mrb[1].mxu1  ;;  %v5105_v15 = vadd.f32 %v4175_v12, %v3944_v11 }
 0x111   : > { %v5102_v14 = vadd.f32 %v3944_v11, %v992_v13 }
 0x113   : > { %1002 = vrot.lane.b32.xlu0 %v5102_v14, %s4861_s20 }
 0x117   : > { %1080 = vrot.lane.b32.xlu0 %v5105_v15, %s4861_s20  ;;  %s4868_s20 = smov 48  }
 0x185   : > { %v1003_v16 = vpop.permute.xlu0 %1002 }
 0x186   : > { %4177 = vmatpush3.xpose.msk.msra.mxu1 %vm1004_vm3, %v1003_v16 }
 0x187   : > { %4181 = vmatprep.subr.mxu1 %v4859_v10 }
 0x189   : > { %4179 = vmatmul.mubr.msk.f32.vlgmr.msra.gmra.mrb[2].mxu1 %vm1004_vm3, %v5102_v14  ;;  %v1081_v17 = vpop.permute.xlu0 %1080 }
 0x18a   : > { %4182 = vmatpush3.xpose.msk.msra.mxu1 %vm1004_vm3, %v1081_v17  ;;  %4183 = vmatprep.mubr.msk.f32.mxu1 %vm4860_vm2, %v4859_v10 }
 0x18b   : > { %4191 = vmatprep.subr.mxu1 %v4859_v10 }
 0x18d   : > { %4184 = vmatmul.mubr.msk.f32.vlgmr.msra.gmra.mrb[4].mxu1 %vm1004_vm3, %v5105_v15 }
 0x18e   : > { %4193 = vmatprep.mubr.msk.f32.mxu1 %vm4860_vm2, %v4859_v10 }
 0x25c   : > { %v1075_v18 = vpop.f32.mrb[2].mxu1 }
 0x25d   : > { %v1156_v20 = vmul.f32 0.35355338, %v1075_v18  ;;  %v4180_v21 = vpop.f32.mrb[3].mxu1 }
 0x25f   : > { %v1170_v22 = vadd.f32 %v5123_v19, %v1156_v20 }
 0x260   : > { %v1152_v23 = vpop.f32.mrb[4].mxu1 }
 0x261   : > { %v1157_v25 = vmul.f32 0.35355338, %v1152_v23  ;;  %v4185_v26 = vpop.f32.mrb[5].mxu1  ;;  %v1172_v27 = vsel %vm1004_vm3, %v1170_v22, -inf }
 0x262   : > { %1173 = vmax.xlane.f32.xlu1 %v1172_v27 }
 0x263   : > { %v1171_v28 = vadd.f32 %v5129_v24, %v1157_v25 }
 0x265   : > { %v1175_v29 = vsel %vm1004_vm3, %v1171_v28, -inf }
 0x266   : > { %1176 = vmax.xlane.f32.xlu1 %v1175_v29 }
 0x277   : > { %1194 = vrot.lane.b32.xlu1 %v5102_v14, %s4862_s14 }
 0x27b   : > { %1270 = vrot.lane.b32.xlu1 %v5105_v15, %s4862_s14  ;;  %s4873_s14 = smov 16  }
 0x27f   : > { %1348 = vrot.lane.b32.xlu1 %v5102_v14, %s4863_s23 }
 0x283   : > { %1426 = vrot.lane.b32.xlu1 %v5105_v15, %s4863_s23  ;;  %s4874_s23 = smov 24  }
 0x2ef   : > { %v1174_v30 = vpop.xlane.xlu1 %1173 }
 0x2f0   : > { %v1178_v31 = vsub.f32 %v1170_v22, %v1174_v30 }
 0x2f2   : > { %v1180_v32 = vmul.f32 1.442695, %v1178_v31 }
 0x2f3   : > { %v1177_v33 = vpop.xlane.xlu1 %1176 }
 0x2f4   : > { %4733 = vpow2.f32 %v1180_v32  ;;  %v1179_v34 = vsub.f32 %v1171_v28, %v1177_v33 }
 0x2f6   : > { %v1182_v35 = vmul.f32 1.442695, %v1179_v34 }
 0x2f7   : > { %v1195_v36 = vpop.permute.xlu1 %1194 }
 0x2f8   : > { %4735 = vpow2.f32 %v1182_v35  ;;  %4187 = vmatpush3.msra.mxu0 %v1195_v36 }
 0x2f9   : > { %4196 = vmatprep.subr.mxu0 %v4859_v10 }
 0x2fb   : > { %v1271_v37 = vpop.permute.xlu1 %1270 }
 0x2fc   : > { %4192 = vmatpush3.msra.mxu1 %v1271_v37 }
 0x2fd   : > { %4201 = vmatprep.subr.mxu1 %v4859_v10 }
 0x2fe   : > { %v4734_v38 = vpop.eup %4733 }
 0x2ff   : > { %v1184_v39 = vsel %vm1004_vm3, %v4734_v38, 0.0  ;;  %v1349_v42 = vpop.permute.xlu1 %1348 }
 0x300   : > { %1185 = vadd.xlane.f32.xlu0 %v1184_v39 }
 0x302   : > { %v4736_v40 = vpop.eup %4735 }
 0x303   : > { %v1187_v41 = vsel %vm1004_vm3, %v4736_v40, 0.0  ;;  %v1427_v43 = vpop.permute.xlu1 %1426 }
 0x304   : > { %1188 = vadd.xlane.f32.xlu1 %v1187_v41 }
 0x315   : > { %1424 = vrot.lane.b32.xlu1 %v5105_v15, %s4864_s25 }
 0x316   : > { %1346 = vrot.lane.b32.xlu0 %v5102_v14, %s4864_s25  ;;  %s5973_s25 = sld [smem:[#allocation23_spill]] (!%p3985_p5) }
 0x38d   : > { %v1186_v44 = vpop.xlane.xlu0 %1185 }
 0x38e   : > { %4737 = vrcp.f32 %v1186_v44 }
 0x391   : > { %v1189_v45 = vpop.xlane.xlu1 %1188  ;;  %v1347_v50 = vpop.permute.xlu0 %1346 }
 0x392   : > { %4739 = vrcp.f32 %v1189_v45 }
 0x395   : > { %v1425_v51 = vpop.permute.xlu1 %1424 }
 0x398   : > { %v4738_v46 = vpop.eup %4737 }
 0x399   : > { %v1192_v47 = vmul.f32 %v4738_v46, %v4734_v38 }
 0x39b   : > { %4189 = vmatmul.mubr.msk.f32.vlgmr.msra.gmra.mrb[0].mxu0 %vm1004_vm3, %v1192_v47 }
 0x39c   : > { %v4740_v48 = vpop.eup %4739  ;;  %4197 = vmatpush3.xpose.msk.msra.mxu0 %vm1004_vm3, %v1349_v42  ;;  %4198 = vmatprep.mubr.msk.f32.mxu0 %vm4860_vm2, %v4859_v10 }
 0x39d   : > { %v1193_v49 = vmul.f32 %v4740_v48, %v4736_v40  ;;  %4206 = vmatprep.subr.mxu0 %v4859_v10 }
 0x39f   : > { %4194 = vmatmul.mubr.msk.f32.vlgmr.msra.gmra.mrb[6].mxu1 %vm1004_vm3, %v1193_v49  ;;  %4199 = vmatmul.mubr.msk.f32.vlgmr.msra.gmra.mrb[2].mxu0 %vm1004_vm3, %v1347_v50 }
 0x3a0   : > { %4202 = vmatpush3.xpose.msk.msra.mxu1 %vm1004_vm3, %v1427_v43  ;;  %4203 = vmatprep.mubr.msk.f32.mxu1 %vm4860_vm2, %v4859_v10 }
 0x3a1   : > { %4211 = vmatprep.subr.mxu1 %v4859_v10  ;;  %4208 = vmatprep.mubr.msk.f32.mxu0 %vm4860_vm2, %v4859_v10 }
 0x3a3   : > { %4204 = vmatmul.mubr.msk.f32.vlgmr.msra.gmra.mrb[8].mxu1 %vm1004_vm3, %v1425_v51 }
 0x3a4   : > { %4213 = vmatprep.mubr.msk.f32.mxu1 %vm4860_vm2, %v4859_v10 }
 0x46e   : > { %v5160_v52 = vpop.f32.mrb[0].mxu0 }
 0x46f   : > { %v4190_v53 = vpop.f32.mrb[1].mxu0 }
 0x472   : > { %v5162_v54 = vpop.f32.mrb[6].mxu1  ;;  %v1420_v55 = vpop.f32.mrb[2].mxu0 }
 0x473   : > { %v1502_v56 = vmul.f32 0.35355338, %v1420_v55  ;;  %v4195_v57 = vpop.f32.mrb[7].mxu1  ;;  %v4200_v58 = vpop.f32.mrb[3].mxu0 }
 0x475   : > { %v1504_v59 = vadd.f32 %v5123_v19, %v1502_v56 }
 0x476   : > { %v1498_v60 = vpop.f32.mrb[8].mxu1 }
 0x477   : > { %v1503_v61 = vmul.f32 0.35355338, %v1498_v60  ;;  %v4205_v62 = vpop.f32.mrb[9].mxu1  ;;  %v1506_v63 = vsel %vm1004_vm3, %v1504_v59, -inf }
 0x478   : > { %1507 = vmax.xlane.f32.xlu1 %v1506_v63 }
 0x479   : > { %v1505_v0 = vadd.f32 %v5129_v24, %v1503_v61 }
 0x47b   : > { %v1509_v1 = vsel %vm1004_vm3, %v1505_v0, -inf }
 0x47c   : > { %1510 = vmax.xlane.f32.xlu0 %v1509_v1 }
 0x489   : > { %1528 = vrot.lane.b32.xlu1 %v5102_v14, %s4865_s22 }
 0x48d   : > { %1682 = vrot.lane.b32.xlu1 %v5102_v14, %s4866_s17 }
 0x491   : > { %1760 = vrot.lane.b32.xlu1 %v5105_v15, %s4866_s17  ;;  %s5976_s17 = sld [smem:[#allocation24_spill]] (!%p3985_p5) }
 0x492   : > { %1604 = vrot.lane.b32.xlu0 %v5105_v15, %s4865_s22 }
 0x496   : > { %1680 = vrot.lane.b32.xlu0 %v5102_v14, %s4867_s19 }
 0x505   : > { %v1508_v2 = vpop.xlane.xlu1 %1507 }
 0x506   : > { %v1512_v3 = vsub.f32 %v1504_v59, %v1508_v2 }
 0x508   : > { %v1514_v4 = vmul.f32 1.442695, %v1512_v3 }
 0x509   : > { %v1529_v5 = vpop.permute.xlu1 %1528  ;;  %v1511_v6 = vpop.xlane.xlu0 %1510 }
 0x50a   : > { %4741 = vpow2.f32 %v1514_v4  ;;  %v1513_v8 = vsub.f32 %v1505_v0, %v1511_v6  ;;  %4207 = vmatpush3.msra.mxu0 %v1529_v5 }
 0x50b   : > { %4216 = vmatprep.subr.mxu0 %v4859_v10 }
 0x50c   : > { %v1516_v11 = vmul.f32 1.442695, %v1513_v8 }
 0x50d   : > { %v1605_v12 = vpop.permute.xlu0 %1604  ;;  %v1683_v20 = vpop.permute.xlu1 %1682 }
 0x50e   : > { %4743 = vpow2.f32 %v1516_v11  ;;  %4212 = vmatpush3.msra.mxu1 %v1605_v12 }
 0x50f   : > { %4221 = vmatprep.subr.mxu1 %v4859_v10 }
 0x511   : > { %v1761_v21 = vpop.permute.xlu1 %1760  ;;  %v1681_v29 = vpop.permute.xlu0 %1680 }
 0x514   : > { %v4742_v13 = vpop.eup %4741 }
 0x515   : > { %v1518_v16 = vsel %vm1004_vm3, %v4742_v13, 0.0 }
 0x516   : > { %1519 = vadd.xlane.f32.xlu1 %v1518_v16 }
 0x518   : > { %v4744_v17 = vpop.eup %4743 }
 0x519   : > { %v1521_v18 = vsel %vm1004_vm3, %v4744_v17, 0.0 }
 0x51a   : > { %1522 = vadd.xlane.f32.xlu1 %v1521_v18 }
 0x52b   : > { %1758 = vrot.lane.b32.xlu1 %v5105_v15, %s4867_s19  ;;  %s5972_s19 = sld [smem:[#allocation20_spill]] (!%p3985_p5) }
 0x5a3   : > { %v1520_v22 = vpop.xlane.xlu1 %1519 }
 0x5a4   : > { %4745 = vrcp.f32 %v1520_v22 }
 0x5a7   : > { %v1523_v23 = vpop.xlane.xlu1 %1522 }
 0x5a8   : > { %4747 = vrcp.f32 %v1523_v23 }
 0x5ab   : > { %v1759_v30 = vpop.permute.xlu1 %1758 }
 0x5ae   : > { %v4746_v25 = vpop.eup %4745 }
 0x5af   : > { %v1526_v26 = vmul.f32 %v4746_v25, %v4742_v13 }
 0x5b1   : > { %4209 = vmatmul.mubr.msk.f32.vlgmr.msra.gmra.mrb[4].mxu0 %vm1004_vm3, %v1526_v26 }
 0x5b2   : > { %v4748_v27 = vpop.eup %4747  ;;  %4217 = vmatpush3.xpose.msk.msra.mxu0 %vm1004_vm3, %v1683_v20  ;;  %4218 = vmatprep.mubr.msk.f32.mxu0 %vm4860_vm2, %v4859_v10 }
 0x5b3   : > { %v1527_v28 = vmul.f32 %v4748_v27, %v4744_v17  ;;  %4226 = vmatprep.subr.mxu0 %v4859_v10 }
 0x5b5   : > { %4214 = vmatmul.mubr.msk.f32.vlgmr.msra.gmra.mrb[10].mxu1 %vm1004_vm3, %v1527_v28  ;;  %4219 = vmatmul.mubr.msk.f32.vlgmr.msra.gmra.mrb[6].mxu0 %vm1004_vm3, %v1681_v29 }
 0x5b6   : > { %4222 = vmatpush3.xpose.msk.msra.mxu1 %vm1004_vm3, %v1761_v21  ;;  %4223 = vmatprep.mubr.msk.f32.mxu1 %vm4860_vm2, %v4859_v10 }
 0x5b7   : > { %4231 = vmatprep.subr.mxu1 %v4859_v10  ;;  %4228 = vmatprep.mubr.msk.f32.mxu0 %vm4860_vm2, %v4859_v10 }
 0x5b9   : > { %4224 = vmatmul.mubr.msk.f32.vlgmr.msra.gmra.mrb[12].mxu1 %vm1004_vm3, %v1759_v30 }
 0x5ba   : > { %4233 = vmatprep.mubr.msk.f32.mxu1 %vm4860_vm2, %v4859_v10 }
 0x684   : > { %v5194_v31 = vpop.f32.mrb[4].mxu0 }
 0x685   : > { %v4210_v32 = vpop.f32.mrb[5].mxu0 }
 0x688   : > { %v5196_v33 = vpop.f32.mrb[10].mxu1  ;;  %v1754_v34 = vpop.f32.mrb[6].mxu0 }
 0x689   : > { %v1836_v35 = vmul.f32 0.35355338, %v1754_v34  ;;  %v4215_v36 = vpop.f32.mrb[11].mxu1  ;;  %v4220_v37 = vpop.f32.mrb[7].mxu0 }
 0x68b   : > { %v1838_v38 = vadd.f32 %v5123_v19, %v1836_v35 }
 0x68c   : > { %v1832_v39 = vpop.f32.mrb[12].mxu1 }
 0x68d   : > { %v1837_v40 = vmul.f32 0.35355338, %v1832_v39  ;;  %v4225_v41 = vpop.f32.mrb[13].mxu1  ;;  %v1840_v42 = vsel %vm1004_vm3, %v1838_v38, -inf }
 0x68e   : > { %1841 = vmax.xlane.f32.xlu0 %v1840_v42  ;;  %v2381_v41 = vld [vmem:[%s5035_s5 + $0x8] sm:$0xff]  ;;  %v2382_v42 = vld [vmem:[%s5035_s5 + $0x10] sm:$0xff] }
 0x68f   : > { %v1839_v43 = vadd.f32 %v5129_v24, %v1837_v40  ;;  %v2380_v40 = vld [vmem:[%s5035_s5] sm:$0xff] }
 0x691   : > { %v1843_v44 = vsel %vm1004_vm3, %v1839_v43, -inf }
 0x692   : > { %1844 = vmax.xlane.f32.xlu1 %v1843_v44 }
 0x6a3   : > { %1862 = vrot.lane.b32.xlu1 %v5102_v14, %s4868_s20 }
 0x6a4   : > { %1938 = vrot.lane.b32.xlu0 %v5105_v15, %s4868_s20 }
 0x6a7   : > { %2016 = vrot.lane.b32.xlu1 %v5102_v14, %s4869_s6 }
 0x6ab   : > { %2094 = vrot.lane.b32.xlu1 %v5105_v15, %s4869_s6 }
 0x6af   : > { %2092 = vrot.lane.b32.xlu1 %v5105_v15, %s4870_s28 }
 0x71b   : > { %v1842_v45 = vpop.xlane.xlu0 %1841 }
 0x71c   : > { %v1846_v46 = vsub.f32 %v1838_v38, %v1842_v45 }
 0x71e   : > { %v1848_v47 = vmul.f32 1.442695, %v1846_v46 }
 0x71f   : > { %v1845_v48 = vpop.xlane.xlu1 %1844  ;;  %v1939_v49 = vpop.permute.xlu0 %1938 }
 0x720   : > { %4749 = vpow2.f32 %v1848_v47  ;;  %v1847_v50 = vsub.f32 %v1839_v43, %v1845_v48  ;;  %4232 = vmatpush3.msra.mxu1 %v1939_v49  ;;  %v2383_v43 = vld [vmem:[%s5035_s5 + $0x18] sm:$0xff]  ;;  %s5975_s5 = sld [smem:[#allocation22_spill]] (!%p3985_p5) }
 0x721   : > { %4241 = vmatprep.subr.mxu1 %v4859_v10  ;;  %v4496_v44 = vpack.c.bf16 %v2383_v43, %v2382_v42  ;;  %v2632_v42 = vld [vmem:[%s5062_s24 + $0x18] sm:$0xff] }
 0x722   : > { %v1850_v51 = vmul.f32 1.442695, %v1847_v50 }
 0x723   : > { %v1863_v53 = vpop.permute.xlu1 %1862 }
 0x724   : > { %4751 = vpow2.f32 %v1850_v51  ;;  %4227 = vmatpush3.msra.mxu0 %v1863_v53 }
 0x725   : > { %4236 = vmatprep.subr.mxu0 %v4859_v10 }
 0x727   : > { %v2017_v61 = vpop.permute.xlu1 %2016 }
 0x72a   : > { %v4750_v55 = vpop.eup %4749 }
 0x72b   : > { %v1852_v56 = vsel %vm1004_vm3, %v4750_v55, 0.0  ;;  %v2095_v1 = vpop.permute.xlu1 %2094 }
 0x72c   : > { %1853 = vadd.xlane.f32.xlu0 %v1852_v56 }
 0x72e   : > { %v4752_v57 = vpop.eup %4751 }
 0x72f   : > { %v1855_v58 = vsel %vm1004_vm3, %v4752_v57, 0.0  ;;  %v2093_v4 = vpop.permute.xlu1 %2092 }
 0x730   : > { %1856 = vadd.xlane.f32.xlu0 %v1855_v58 }
 0x746   : > { %2014 = vrot.lane.b32.xlu0 %v5102_v14, %s4870_s28  ;;  %s5978_s28 = sld [smem:[#allocation26_spill]] (!%p3985_p5) }
 0x7b9   : > { %v1854_v59 = vpop.xlane.xlu0 %1853 }
 0x7ba   : > { %4753 = vrcp.f32 %v1854_v59 }
 0x7bd   : > { %v1857_v60 = vpop.xlane.xlu0 %1856 }
 0x7be   : > { %4755 = vrcp.f32 %v1857_v60 }
 0x7c1   : > { %v2015_v3 = vpop.permute.xlu0 %2014 }
 0x7c4   : > { %v4754_v62 = vpop.eup %4753 }
 0x7c5   : > { %v1860_v63 = vmul.f32 %v4754_v62, %v4750_v55 }
 0x7c7   : > { %4229 = vmatmul.mubr.msk.f32.vlgmr.msra.gmra.mrb[8].mxu0 %vm1004_vm3, %v1860_v63 }
 0x7c8   : > { %v4756_v0 = vpop.eup %4755  ;;  %4237 = vmatpush3.xpose.msk.msra.mxu0 %vm1004_vm3, %v2017_v61  ;;  %4238 = vmatprep.mubr.msk.f32.mxu0 %vm4860_vm2, %v4859_v10 }
 0x7c9   : > { %v1861_v2 = vmul.f32 %v4756_v0, %v4752_v57  ;;  %4246 = vmatprep.subr.mxu0 %v4859_v10 }
 0x7cb   : > { %4234 = vmatmul.mubr.msk.f32.vlgmr.msra.gmra.mrb[14].mxu1 %vm1004_vm3, %v1861_v2  ;;  %4239 = vmatmul.mubr.msk.f32.vlgmr.msra.gmra.mrb[10].mxu0 %vm1004_vm3, %v2015_v3 }
 0x7cc   : > { %4242 = vmatpush3.xpose.msk.msra.mxu1 %vm1004_vm3, %v2095_v1  ;;  %4243 = vmatprep.mubr.msk.f32.mxu1 %vm4860_vm2, %v4859_v10 }
 0x7cd   : > { %4251 = vmatprep.subr.mxu1 %v4859_v10  ;;  %4248 = vmatprep.mubr.msk.f32.mxu0 %vm4860_vm2, %v4859_v10 }
 0x7cf   : > { %4244 = vmatmul.mubr.msk.f32.vlgmr.msra.gmra.mrb[16].mxu1 %vm1004_vm3, %v2093_v4 }
 0x7d0   : > { %4253 = vmatprep.mubr.msk.f32.mxu1 %vm4860_vm2, %v4859_v10  ;;  %vm3107_vm2 = vcmask (!%p3985_p5), 58368  }
 0x89a   : > { %v1934_v5 = vpop.f32.mrb[8].mxu0 }
 0x89b   : > { %v4230_v6 = vpop.f32.mrb[9].mxu0 }
 0x89e   : > { %v2010_v8 = vpop.f32.mrb[14].mxu1  ;;  %v2088_v11 = vpop.f32.mrb[10].mxu0 }
 0x89f   : > { %v2170_v12 = vmul.f32 0.35355338, %v2088_v11  ;;  %v4235_v13 = vpop.f32.mrb[15].mxu1  ;;  %v4240_v16 = vpop.f32.mrb[11].mxu0 }
 0x8a1   : > { %v2172_v17 = vadd.f32 %v5123_v19, %v2170_v12 }
 0x8a2   : > { %v2166_v18 = vpop.f32.mrb[16].mxu1 }
 0x8a3   : > { %v2171_v20 = vmul.f32 0.35355338, %v2166_v18  ;;  %v4245_v21 = vpop.f32.mrb[17].mxu1  ;;  %v2174_v22 = vsel %vm1004_vm3, %v2172_v17, -inf }
 0x8a4   : > { %2175 = vmax.xlane.f32.xlu0 %v2174_v22  ;;  %v2520_v21 = vld [vmem:[%s5052_s3 + $0x8] sm:$0xff] }
 0x8a5   : > { %v2173_v23 = vadd.f32 %v5129_v24, %v2171_v20  ;;  %v2519_v20 = vld [vmem:[%s5052_s3] sm:$0xff] }
 0x8a6   : > { %v4500_v22 = vpack.c.bf16 %v2520_v21, %v2519_v20 }
 0x8a7   : > { %v2177_v25 = vsel %vm1004_vm3, %v2173_v23, -inf }
 0x8a8   : > { %2178 = vmax.xlane.f32.xlu1 %v2177_v25  ;;  %v2522_v25 = vld [vmem:[%s5052_s3 + $0x18] sm:$0xff] }
 0x8b9   : > { %2196 = vrot.lane.b32.xlu1 %v5102_v14, %s4871_s30 }
 0x8bd   : > { %2350 = vrot.lane.b32.xlu1 %v5194_v31, %s4872_s8 }
 0x8c1   : > { %2352 = vrot.lane.b32.xlu1 %v5196_v33, %s4872_s8  ;;  %s4877_s8 = smov (!%p3985_p5), 96  }
 0x8c5   : > { %2360 = vrot.lane.b32.xlu1 %v2010_v8, %s4873_s14 }
 0x931   : > { %v2176_v10 = vpop.xlane.xlu0 %2175 }
 0x932   : > { %v2180_v19 = vsub.f32 %v2172_v17, %v2176_v10 }
 0x934   : > { %v2182_v26 = vmul.f32 1.442695, %v2180_v19 }
 0x935   : > { %v2179_v27 = vpop.xlane.xlu1 %2178 }
 0x936   : > { %4757 = vpow2.f32 %v2182_v26  ;;  %v2181_v28 = vsub.f32 %v2173_v23, %v2179_v27  ;;  %v2521_v23 = vld [vmem:[%s5052_s3 + $0x10] sm:$0xff]  ;;  %s4879_s3 = smov (!%p3985_p5), 8  }
 0x937   : > { %v4504_v10 = vpack.c.bf16 %v2522_v25, %v2521_v23 }
 0x938   : > { %v2184_v24 = vmul.f32 1.442695, %v2181_v28 }
 0x939   : > { %v2197_v29 = vpop.permute.xlu1 %2196 }
 0x93a   : > { %4759 = vpow2.f32 %v2184_v24  ;;  %4247 = vmatpush3.msra.mxu0 %v2197_v29 }
 0x93d   : > { %v2351_v49 = vpop.permute.xlu1 %2350 }
 0x93e   : > { %v2372_v53 = vsel %vm1004_vm3, %v5160_v52, %v2351_v49  ;;  %v3973_v52 = vld [vmem:[%s866_s21] ss:$0 sm:$0xff] }
 0x940   : > { %v4758_v30 = vpop.eup %4757 }
 0x941   : > { %v2186_v14 = vsel %vm1004_vm3, %v4758_v30, 0.0  ;;  %v2353_v50 = vpop.permute.xlu1 %2352 }
 0x942   : > { %2187 = vadd.xlane.f32.xlu0 %v2186_v14  ;;  %v2373_v59 = vsel %vm1004_vm3, %v5162_v54, %v2353_v50  ;;  %v3976_v14 = vld [vmem:[%s869_s15] ss:$0 sm:$0xff] }
 0x943   : > { %v2637_v50 = vld [vmem:[%s5062_s24 + $0x40] sm:$0xff] }
 0x944   : > { %v4760_v32 = vpop.eup %4759 }
 0x945   : > { %v2189_v31 = vsel %vm1004_vm3, %v4760_v32, 0.0  ;;  %v2361_v55 = vpop.permute.xlu1 %2360 }
 0x946   : > { %2190 = vadd.xlane.f32.xlu0 %v2189_v31  ;;  %v2376_v60 = vsel %vm2374_vm5, %v2373_v59, %v2361_v55  ;;  %v3977_v31 = vld [vmem:[%s872_s29] ss:$0 sm:$0xff]  ;;  %v2642_v59 = vld [vmem:[%s5062_s24 + $0x68] sm:$0xff] }
 0x95c   : > { %2272 = vrot.lane.b32.xlu0 %v5105_v15, %s4871_s30  ;;  %v4492_v15 = vpack.c.bf16 %v2381_v41, %v2380_v40  ;;  %v2630_v40 = vld [vmem:[%s5062_s24 + $0x8] sm:$0xff] }
 0x960   : > { %2358 = vrot.lane.b32.xlu0 %v1934_v5, %s4873_s14  ;;  %s3984_s14 = sshll.u32 %s5016_s26, 1 }
 0x9cf   : > { %v2188_v33 = vpop.xlane.xlu0 %2187 }
 0x9d0   : > { %4761 = vrcp.f32 %v2188_v33 }
 0x9d3   : > { %v2191_v34 = vpop.xlane.xlu0 %2190 }
 0x9d4   : > { %4763 = vrcp.f32 %v2191_v34 }
 0x9d7   : > { %v2273_v35 = vpop.permute.xlu0 %2272 }
 0x9d8   : > { %4252 = vmatpush3.msra.mxu1 %v2273_v35 }
 0x9d9   : > { %4493 = vmatprep.subr.bf16.mxu1 %v4492_v15 }
 0x9da   : > { %v4762_v36 = vpop.eup %4761 }
 0x9db   : > { %v2194_v37 = vmul.f32 %v4762_v36, %v4758_v30  ;;  %v2359_v51 = vpop.permute.xlu0 %2358 }
 0x9dc   : > { %v2375_v56 = vsel %vm2374_vm5, %v2372_v53, %v2359_v51  ;;  %v2638_v51 = vld [vmem:[%s5062_s24 + $0x48] sm:$0xff]  ;;  %v2639_v53 = vld [vmem:[%s5062_s24 + $0x50] sm:$0xff] }
 0x9dd   : > { %4249 = vmatmul.mubr.msk.f32.vlgmr.msra.gmra.mrb[12].mxu0 %vm1004_vm3, %v2194_v37  ;;  %v4524_v55 = vpack.c.bf16 %v2638_v51, %v2637_v50  ;;  %v3983_v50 = vld [vmem:[%s894_s7] ss:$0 sm:$0xff]  ;;  %s4876_s7 = smov (!%p3985_p5), 64  }
 0x9de   : > { %v4764_v38 = vpop.eup %4763 }
 0x9df   : > { %v2195_v39 = vmul.f32 %v4764_v38, %v4760_v32 }
 0x9e1   : > { %4254 = vmatmul.mubr.msk.f32.vlgmr.msra.gmra.mrb[18].mxu1 %vm1004_vm3, %v2195_v39  ;;  %v2629_v39 = vld [vmem:[%s5062_s24] sm:$0xff] }
 0x9e2   : > { %4495 = vmatpush3.bf16.msra.mxu1 %v4492_v15  ;;  %v4508_v41 = vpack.c.bf16 %v2630_v40, %v2629_v39  ;;  %v2631_v15 = vld [vmem:[%s5062_s24 + $0x10] sm:$0xff] }
 0x9e3   : > { %4497 = vmatprep.subr.bf16.mxu1 %v4496_v44  ;;  %v4512_v43 = vpack.c.bf16 %v2632_v42, %v2631_v15 }
 0x9e4   : > { %4509 = vmatprep.subr.bf16.mxu0 %v4508_v41 }
 0x9e5   : > { %4511 = vmatpush3.bf16.msra.mxu0 %v4508_v41 }
 0x9e6   : > { %4499 = vmatpush3.bf16.msra.mxu1 %v4496_v44  ;;  %4513 = vmatprep.subr.bf16.mxu0 %v4512_v43  ;;  %v2633_v44 = vld [vmem:[%s5062_s24 + $0x20] sm:$0xff] }
 0x9e7   : > { %4501 = vmatprep.subr.bf16.mxu1 %v4500_v22 }
 0x9e9   : > { %4515 = vmatpush3.bf16.msra.mxu0 %v4512_v43 }
 0xab0   : > { %v2268_v45 = vpop.f32.mrb[12].mxu0 }
 0xab1   : > { %2366 = vrot.lane.b32.xlu0 %v2268_v45, %s4874_s23  ;;  %v4250_v46 = vpop.f32.mrb[13].mxu0  ;;  %v2634_v45 = vld [vmem:[%s5062_s24 + $0x28] sm:$0xff] }
 0xab2   : > { %v4516_v46 = vpack.c.bf16 %v2634_v45, %v2633_v44 }
 0xab4   : > { %v2344_v47 = vpop.f32.mrb[18].mxu1  ;;  %4517 = vmatprep.subr.bf16.mxu0 %v4516_v46 }
 0xab5   : > { %2368 = vrot.lane.b32.xlu1 %v2344_v47, %s4874_s23  ;;  %v4255_v48 = vpop.f32.mrb[19].mxu1  ;;  %4519 = vmatpush3.bf16.msra.mxu0 %v4516_v46  ;;  %v2635_v47 = vld [vmem:[%s5062_s24 + $0x30] sm:$0xff] }
 0xab6   : > { %v2636_v48 = vld [vmem:[%s5062_s24 + $0x38] sm:$0xff] }
 0xab7   : > { %v4520_v49 = vpack.c.bf16 %v2636_v48, %v2635_v47  ;;  %v3982_v47 = vld [vmem:[%s891_s0] ss:$0 sm:$0xff]  ;;  %s2782_s0 = scalar_lea.vmem [#allocation3], %s3984_s14  ;;  %s5974_s14 = sld [smem:[#allocation21_spill]] (!%p3985_p5) }
 0xab9   : > { %4521 = vmatprep.subr.bf16.mxu0 %v4520_v49 }
 0xaba   : > { %4523 = vmatpush3.bf16.msra.mxu0 %v4520_v49 }
 0xabb   : > { %4525 = vmatprep.subr.bf16.mxu0 %v4524_v55 }
 0xabe   : > { %4527 = vmatpush3.bf16.msra.mxu0 %v4524_v55 }
 0xb23   : > { %v2367_v57 = vpop.permute.xlu0 %2366 }
 0xb24   : > { %v2378_v58 = vsel %vm2377_vm4, %v2375_v56, %v2367_v57  ;;  %v2640_v56 = vld [vmem:[%s5062_s24 + $0x58] sm:$0xff] }
 0xb25   : > { %4264 = vmatprep.mubr.msk.f32.mxu1 %vm919_vm1, %v2378_v58  ;;  %v4528_v57 = vpack.c.bf16 %v2640_v56, %v2639_v53  ;;  %v2641_v58 = vld [vmem:[%s5062_s24 + $0x60] sm:$0xff] }
 0xb27   : > { %v2369_v61 = vpop.permute.xlu1 %2368  ;;  %4529 = vmatprep.subr.bf16.mxu0 %v4528_v57 }
 0xb28   : > { %v2379_v62 = vsel %vm2377_vm4, %v2376_v60, %v2369_v61  ;;  %v4532_v60 = vpack.c.bf16 %v2642_v59, %v2641_v58  ;;  %v2643_v61 = vld [vmem:[%s5062_s24 + $0x70] sm:$0xff]  ;;  %4531 = vmatpush3.bf16.msra.mxu0 %v4528_v57 }
 0xb29   : > { %4265 = vmatmul.mubr.msk.f32.vlgmr.msra.gmra.mrb[20].mxu1 %vm919_vm1, %v2379_v62  ;;  %v2644_v62 = vld [vmem:[%s5062_s24 + $0x78] sm:$0xff] }
 0xb2a   : > { %4503 = vmatpush3.bf16.msra.mxu1 %v4500_v22  ;;  %4533 = vmatprep.subr.bf16.mxu0 %v4532_v60 }
 0xb2b   : > { %4505 = vmatprep.subr.bf16.mxu1 %v4504_v10 }
 0xb2c   : > { %4535 = vmatpush3.bf16.msra.mxu0 %v4532_v60 }
 0xb2e   : > { %4507 = vmatpush3.bf16.msra.mxu1 %v4504_v10  ;;  %v3981_v10 = vld [vmem:[%s888_s18] ss:$0 sm:$0xff] }
 0xbfc   : > { %v4266_v63 = vpop.f32.mrb[20].mxu1 }
 0xbfd   : > { %v2469_v0 = vadd.f32 %v4266_v63, %v3973_v52  ;;  %v2463_v1 = vpop.f32.mrb[21].mxu1  ;;  %v3978_v63 = vld [vmem:[%s880_s1] ss:$0 sm:$0xff]  ;;  %s4882_s1 = smov (!%p3985_p5), 16  }
 0xbfe   : > { %v2464_v2 = vadd.f32 %v3973_v52, %v2463_v1  ;;  %v4536_v52 = vpack.c.bf16 %v2644_v62, %v2643_v61 }
 0xbff   : > { %v2473_v3 = vadd.f32 %v2469_v0, %v5087_v9 }
 0xc00   : > { %v2472_v54 = vadd.f32 %v2464_v2, %v5083_v7  ;;  %4537 = vmatprep.subr.bf16.mxu0 %v4536_v52 }
 0xc01   : > { %v2479_v4 = vsel %vm919_vm1, %v2473_v3, 0.0  ;;  %4539 = vmatpush3.bf16.msra.mxu0 %v4536_v52 }
 0xc02   : > { %2480 = vadd.xlane.f32.xlu1 %v2479_v4  ;;  %v2476_v5 = vsel %vm919_vm1, %v2472_v54, 0.0 }
 0xc03   : > { %2477 = vadd.xlane.f32.xlu0 %v2476_v5 }
 0xc8f   : > { %v2481_v6 = vpop.xlane.xlu1 %2480 }
 0xc90   : > { %v2484_v8 = vmul.f32 0.03125, %v2481_v6  ;;  %v2478_v11 = vpop.xlane.xlu0 %2477 }
 0xc91   : > { %v2483_v12 = vmul.f32 0.03125, %v2478_v11 }
 0xc92   : > { %v2486_v13 = vsub.f32 %v2473_v3, %v2484_v8 }
 0xc93   : > { %v2485_v16 = vsub.f32 %v2472_v54, %v2483_v12 }
 0xc94   : > { %v2488_v7 = vmul.f32 %v2486_v13, %v2486_v13 }
 0xc95   : > { %v2487_v17 = vmul.f32 %v2485_v16, %v2485_v16 }
 0xc96   : > { %v2492_v18 = vsel %vm919_vm1, %v2488_v7, 0.0 }
 0xc97   : > { %v2489_v9 = vsel %vm919_vm1, %v2487_v17, 0.0 }
 0xc98   : > { %2490 = vadd.xlane.f32.xlu0 %v2489_v9 }
 0xc9c   : > { %2493 = vadd.xlane.f32.xlu0 %v2492_v18 }
 0xd25   : > { %v2491_v19 = vpop.xlane.xlu0 %2490 }
 0xd26   : > { %v2495_v26 = vmul.f32 0.03125, %v2491_v19 }
 0xd28   : > { %v2497_v27 = vadd.f32 1e-12, %v2495_v26 }
 0xd29   : > { %v2494_v28 = vpop.xlane.xlu0 %2493 }
 0xd2a   : > { %4765 = vrsqrt.f32 %v2497_v27  ;;  %v2496_v24 = vmul.f32 0.03125, %v2494_v28 }
 0xd2c   : > { %v2498_v29 = vadd.f32 1e-12, %v2496_v24 }
 0xd2e   : > { %4767 = vrsqrt.f32 %v2498_v29 }
 0xd34   : > { %v4766_v30 = vpop.eup %4765 }
 0xd35   : > { %v2501_v32 = vmul.f32 %v4766_v30, %v2485_v16 }
 0xd37   : > { %v2509_v33 = vmul.f32 %v3976_v14, %v2501_v32 }
 0xd38   : > { %v4768_v34 = vpop.eup %4767 }
 0xd39   : > { %v2502_v35 = vmul.f32 %v4768_v34, %v2486_v13  ;;  %v5279_v36 = vadd.f32 %v3977_v31, %v2509_v33 }
 0xd3b   : > { %v2510_v37 = vmul.f32 %v3976_v14, %v2502_v35  ;;  %4275 = vmatprep.mubr.msk.f32.mxu1 %vm919_vm1, %v5279_v36 }
 0xd3d   : > { %v5283_v38 = vadd.f32 %v3977_v31, %v2510_v37 }
 0xd3f   : > { %4276 = vmatmul.mubr.msk.f32.vlgmr.msra.gmra.mrb[22].mxu1 %vm919_vm1, %v5283_v38 }
 0xe12   : > { %v4277_v0 = vpop.f32.mrb[22].mxu1 }
 0xe13   : > { %v2608_v1 = vadd.f32 %v4277_v0, %v3978_v63  ;;  %v2602_v2 = vpop.f32.mrb[23].mxu1 }
 0xe14   : > { %v2603_v3 = vadd.f32 %v3978_v63, %v2602_v2 }
 0xe15   : > { %v2612_v54 = vmul.f32 %v2608_v1, %v2608_v1 }
 0xe16   : > { %v2611_v4 = vmul.f32 %v2603_v3, %v2603_v3 }
 0xe17   : > { %v2614_v5 = vmul.f32 %v2612_v54, %v2608_v1 }
 0xe18   : > { %v2613_v6 = vmul.f32 %v2611_v4, %v2603_v3 }
 0xe19   : > { %v2616_v8 = vmul.f32 0.044715, %v2614_v5 }
 0xe1a   : > { %v2615_v11 = vmul.f32 0.044715, %v2613_v6 }
 0xe1b   : > { %v2618_v12 = vadd.f32 %v2616_v8, %v2608_v1 }
 0xe1c   : > { %v2617_v13 = vadd.f32 %v2615_v11, %v2603_v3 }
 0xe1d   : > { %v2620_v16 = vmul.f32 0.7978846, %v2618_v12 }
 0xe1e   : > { %v2619_v17 = vmul.f32 0.7978846, %v2617_v13 }
 0xe1f   : > { %4769 = vtanh.f32 %v2620_v16 }
 0xe20   : > { %4771 = vtanh.f32 %v2619_v17 }
 0xe29   : > { %v4770_v9 = vpop.eup %4769 }
 0xe2a   : > { %v4772_v7 = vpop.eup %4771  ;;  %v2624_v18 = vadd.f32 1.0, %v4770_v9 }
 0xe2b   : > { %v2623_v20 = vadd.f32 1.0, %v4772_v7 }
 0xe2c   : > { %v2626_v21 = vmul.f32 0.5, %v2624_v18 }
 0xe2d   : > { %v2625_v22 = vmul.f32 0.5, %v2623_v20 }
 0xe2e   : > { %v2628_v25 = vmul.f32 %v2626_v21, %v2608_v1 }
 0xe2f   : > { %v2627_v23 = vmul.f32 %v2625_v22, %v2603_v3 }
 0xe31   : > { %4310 = vmatprep.mubr.f32.mxu0 %v2627_v23 }
 0xe32   : > { %4311 = vmatmul.mubr.f32.vlgmr.msra.gmra.mrb[14].mxu0 %v2628_v25 }
 0xf05   : > { %v4312_v19 = vpop.f32.mrb[14].mxu0 }
 0xf06   : > { %v2724_v26 = vadd.f32 %v4312_v19, %v3981_v10  ;;  %v2718_v27 = vpop.f32.mrb[15].mxu0 }
 0xf07   : > { %v2719_v28 = vadd.f32 %v3981_v10, %v2718_v27 }
 0xf08   : > { %v2728_v24 = vadd.f32 %v2724_v26, %v5283_v38 }
 0xf09   : > { %v2727_v29 = vadd.f32 %v2719_v28, %v5279_v36 }
 0xf0a   : > { %v2734_v30 = vsel %vm919_vm1, %v2728_v24, 0.0 }
 0xf0b   : > { %2735 = vadd.xlane.f32.xlu1 %v2734_v30  ;;  %v2731_v14 = vsel %vm919_vm1, %v2727_v29, 0.0 }
 0xf0c   : > { %2732 = vadd.xlane.f32.xlu0 %v2731_v14 }
 0xf98   : > { %v2736_v32 = vpop.xlane.xlu1 %2735 }
 0xf99   : > { %v2738_v31 = vmul.f32 0.03125, %v2736_v32  ;;  %v2733_v33 = vpop.xlane.xlu0 %2732 }
 0xf9a   : > { %v2737_v34 = vmul.f32 0.03125, %v2733_v33 }
 0xf9b   : > { %v2740_v35 = vsub.f32 %v2728_v24, %v2738_v31 }
 0xf9c   : > { %v2739_v37 = vsub.f32 %v2727_v29, %v2737_v34 }
 0xf9d   : > { %v2742_v39 = vmul.f32 %v2740_v35, %v2740_v35 }
 0xf9e   : > { %v2741_v40 = vmul.f32 %v2739_v37, %v2739_v37 }
 0xf9f   : > { %v2746_v41 = vsel %vm919_vm1, %v2742_v39, 0.0 }
 0xfa0   : > { %2747 = vadd.xlane.f32.xlu1 %v2746_v41  ;;  %v2743_v36 = vsel %vm919_vm1, %v2741_v40, 0.0 }
 0xfa1   : > { %2744 = vadd.xlane.f32.xlu0 %v2743_v36 }
0x102d   : > { %v2748_v38 = vpop.xlane.xlu1 %2747 }
0x102e   : > { %v2750_v15 = vmul.f32 0.03125, %v2748_v38  ;;  %v2745_v42 = vpop.xlane.xlu0 %2744 }
0x102f   : > { %v2749_v43 = vmul.f32 0.03125, %v2745_v42 }
0x1030   : > { %v2752_v44 = vadd.f32 1e-12, %v2750_v15 }
0x1031   : > { %v2751_v45 = vadd.f32 1e-12, %v2749_v43 }
0x1032   : > { %4773 = vrsqrt.f32 %v2752_v44 }
0x1033   : > { %4775 = vrsqrt.f32 %v2751_v45 }
0x103c   : > { %v4774_v46 = vpop.eup %4773 }
0x103d   : > { %v4776_v48 = vpop.eup %4775  ;;  %v2756_v49 = vmul.f32 %v4774_v46, %v2740_v35 }
0x103e   : > { %v2755_v51 = vmul.f32 %v4776_v48, %v2739_v37 }
0x103f   : > { %v2764_v53 = vmul.f32 %v3982_v47, %v2756_v49 }
0x1040   : > { %v2763_v55 = vmul.f32 %v3982_v47, %v2755_v51  ;;  %2788 = sbr.rel (%p3985_p5) target bundleno = 5271 (0x1497), region = 120 }
0x1041   : > { %v2772_v56 = vadd.f32 %v3983_v50, %v2764_v53 }
0x1042   : > { %v2771_v57 = vadd.f32 %v3983_v50, %v2763_v55 }
0x1043   : > { %2774 = vst.msk [vmem:[#allocation2 + $0x8] sm:$0xff] %vm919_vm1, %v2772_v56  ;;  %v2777_v58 = vrot.slane %v2772_v56, 7 }
0x1044   : > { %2773 = vst.msk [vmem:[#allocation2] sm:$0xff] %vm919_vm1, %v2771_v57 }
0x1045   : > { %v2779_v59 = vsel %vm2778_vm6, %v2777_v58, %v2771_v57  ;;  %v3003_v57 = vld [vmem:[%s5921_s16] sm:$0xff] (!%p3985_p5)  ;;  %v3004_v58 = vld [vmem:[%s5921_s16 + $0x8] sm:$0xff] (!%p3985_p5) }
0x1046   : > { %2784 = vst.msk [vmem:[%s2782_s0] sm:$0x3] %vm2783_vm7, %v2779_v59  ;;  %v2865_v59 = vld [vmem:[%s5972_s19] sm:$0xff] (!%p3985_p5)  ;;  %vm4881_vm7 = vmmov (!%p3985_p5), 0   ;;  %s5979_s0 = sld [smem:[#allocation27_spill]] (!%p3985_p5) }
0x104d   : > { %v5334_v60 = vld [vmem:[#allocation3 + $0x12] sm:$0x3]  ;;  %v5336_v61 = vld [vmem:[#allocation3 + $0x14] sm:$0x3]  ;;  %v5339_v52 = vld [vmem:[#allocation3 + $0x4] sm:$0x3] }
0x104e   : > { %v2853_v62 = vrot.slane %v5336_v61, 7  ;;  %v5341_v63 = vld [vmem:[#allocation3 + $0x6] sm:$0x3]  ;;  %v5343_v0 = vld [vmem:[#allocation3 + $0x8] sm:$0x3]  ;;  %v2839_v9 = vrot.slane %v5339_v52, 7 }
0x104f   : > { %v5345_v1 = vld [vmem:[#allocation3 + $0xa] sm:$0x3]  ;;  %v5347_v2 = vld [vmem:[#allocation3 + $0xc] sm:$0x3]  ;;  %v5353_v54 = vld [vmem:[#allocation3 + $0xe] sm:$0x3] }
0x1050   : > { %v2854_v3 = vsel %vm2778_vm6, %v2853_v62, %v5334_v60  ;;  %v5355_v4 = vld [vmem:[#allocation3 + $0x10] sm:$0x3]  ;;  %v2978_v5 = vrot.slane %v5341_v63, 7  ;;  %v2980_v6 = vrot.slane %v5343_v0, 6  ;;  %v2982_v8 = vrot.slane %v5345_v1, 5 }
0x1051   : > { %2975 = vrot.lane.b32.xlu1 %v2854_v3, %s4875_s27  ;;  %v2984_v11 = vrot.slane %v5347_v2, 4  ;;  %v2986_v12 = vrot.slane %v5353_v54, 3  ;;  %v5363_v13 = vld [vmem:[#allocation3 + $0x2] sm:$0x3]  ;;  %v2988_v17 = vrot.slane %v5355_v4, 2  ;;  %v2841_v7 = vrot.slane %v5341_v63, 6 }
0x1052   : > { %v2979_v16 = vsel %vm2778_vm6, %v2978_v5, %v5339_v52  ;;  %v2990_v20 = vrot.slane %v5334_v60, 1  ;;  %v2843_v21 = vrot.slane %v5343_v0, 5  ;;  %v2845_v22 = vrot.slane %v5345_v1, 4  ;;  %v5385_v26 = vld [vmem:[#allocation3 + $0x16] sm:$0x3] }
0x1053   : > { %v2981_v18 = vsel %vm2815_vm8, %v2980_v6, %v2979_v16  ;;  %v2840_v25 = vsel %vm2778_vm6, %v2839_v9, %v5363_v13  ;;  %v2847_v10 = vrot.slane %v5347_v2, 3  ;;  %v2849_v19 = vrot.slane %v5353_v54, 2 }
0x1054   : > { %v2983_v23 = vsel %vm2818_vm9, %v2982_v8, %v2981_v18  ;;  %v2842_v28 = vsel %vm2815_vm8, %v2841_v7, %v2840_v25  ;;  %v2851_v24 = vrot.slane %v5355_v4, 1  ;;  %v3123_v29 = vrot.slane %v5343_v0, 7  ;;  %v3005_v18 = vld [vmem:[%s5921_s16 + $0x10] sm:$0xff] }
0x1055   : > { %v2985_v27 = vsel %vm2821_vm10, %v2984_v11, %v2983_v23  ;;  %v2844_v14 = vsel %vm2818_vm9, %v2843_v21, %v2842_v28  ;;  %v3125_v32 = vrot.slane %v5345_v1, 6  ;;  %v3127_v31 = vrot.slane %v5347_v2, 5  ;;  %v3006_v23 = vld [vmem:[%s5921_s16 + $0x18] sm:$0xff]  ;;  %v2867_v28 = vld [vmem:[%s5972_s19 + $0x10] sm:$0xff] }
0x1056   : > { %v2987_v30 = vsel %vm2824_vm11, %v2986_v12, %v2985_v27  ;;  %v2846_v34 = vsel %vm2821_vm10, %v2845_v22, %v2844_v14  ;;  %v2855_v35 = vrot.slane %v5385_v26, 6  ;;  %v3124_v37 = vsel %vm2778_vm6, %v3123_v29, %v5341_v63 }
0x1057   : > { %v2989_v33 = vsel %vm2827_vm12, %v2988_v17, %v2987_v30  ;;  %v2848_v40 = vsel %vm2824_vm11, %v2847_v10, %v2846_v34  ;;  %v3126_v41 = vsel %vm2815_vm8, %v3125_v32, %v3124_v37  ;;  %v3129_v36 = vrot.slane %v5353_v54, 4 }
0x1058   : > { %v2991_v39 = vsel %vm2830_vm13, %v2990_v20, %v2989_v33  ;;  %v2850_v38 = vsel %vm2827_vm12, %v2849_v19, %v2848_v40  ;;  %v3128_v15 = vsel %vm2818_vm9, %v3127_v31, %v3126_v41  ;;  %v3131_v42 = vrot.slane %v5355_v4, 3  ;;  %v2870_v41 = vld [vmem:[%s5972_s19 + $0x28] sm:$0xff] }
0x1059   : > { %2994 = vrot.lane.b32.xlu1 %v2991_v39, %s4876_s7  ;;  %v3133_v43 = vrot.slane %v5334_v60, 2  ;;  %v2852_v44 = vsel %vm2830_vm13, %v2851_v24, %v2850_v38  ;;  %v3130_v45 = vsel %vm2821_vm10, %v3129_v36, %v3128_v15  ;;  %v3135_v46 = vrot.slane %v5336_v61, 1 }
0x105a   : > { %2857 = vrot.lane.b32.xlu0 %v2852_v44, %s4875_s27  ;;  %v2856_v47 = vsel %vm2815_vm8, %v2855_v35, %v2854_v3  ;;  %v3132_v48 = vsel %vm2824_vm11, %v3131_v42, %v3130_v45  ;;  %v3278_v49 = vsel %vm2815_vm8, %v2839_v9, %v5363_v13  ;;  %v2992_v51 = vrot.slane %v5385_v26, 7 }
0x105b   : > { %v3134_v50 = vsel %vm2827_vm12, %v3133_v43, %v3132_v48  ;;  %v5435_v53 = vsel %vm2778_vm6, %v5334_v60, %v2851_v24  ;;  %v3279_v55 = vsel %vm2818_vm9, %v2841_v7, %v3278_v49  ;;  %v3514_v9 = vsel %vm2815_vm8, %v3123_v29, %v5341_v63  ;;  %v2866_v7 = vld [vmem:[%s5972_s19 + $0x8] sm:$0xff]  ;;  %v2868_v24 = vld [vmem:[%s5972_s19 + $0x18] sm:$0xff] }
0x105c   : > { %v3136_v56 = vsel %vm2830_vm13, %v3135_v46, %v3134_v50  ;;  %v3280_v16 = vsel %vm2821_vm10, %v2843_v21, %v3279_v55  ;;  %v5468_v21 = vsel %vm2815_vm8, %v2853_v62, %v5435_v53  ;;  %v3395_v25 = vsel %vm2815_vm8, %v2978_v5, %v5339_v52 }
0x105d   : > { %3117 = vrot.lane.b32.xlu1 %v5334_v60, %s4875_s27  ;;  %v4777_v3 = vpack.i.bf16 %v5385_v26, %v3136_v56  ;;  %v3515_v27 = vsel %vm2818_vm9, %v3125_v32, %v3514_v9  ;;  %v2993_v29 = vsel %vm2778_vm6, %v2992_v51, %v5336_v61  ;;  %v5485_v62 = vsel %vm2778_vm6, %v5336_v61, %v2990_v20  ;;  %v3007_v20 = vld [vmem:[%s5921_s16 + $0x20] sm:$0xff] }
0x105e   : > { %2859 = vrot.lane.b32.xlu0 %v2856_v47, %s4875_s27  ;;  %v3516_v30 = vsel %vm2821_vm10, %v3127_v31, %v3515_v27  ;;  %v5488_v5 = vpack.c.bf16 %v3004_v58, %v3003_v57  ;;  %v3281_v14 = vsel %vm2824_vm11, %v2845_v22, %v3280_v16  ;;  %v5494_v32 = vpack.c.bf16 %v2866_v7, %v2865_v59  ;;  %v3008_v31 = vld [vmem:[%s5921_s16 + $0x28] sm:$0xff]  ;;  %v3011_v16 = vld [vmem:[%s5921_s16 + $0x40] sm:$0xff] }
0x105f   : > { %v5496_v33 = vpack.c.bf16 %v3006_v23, %v3005_v18  ;;  %v3286_v34 = vsel %vm2818_vm9, %v2855_v35, %v5468_v21  ;;  %v3396_v37 = vsel %vm2818_vm9, %v2980_v6, %v3395_v25  ;;  %v3517_v22 = vsel %vm2824_vm11, %v3129_v36, %v3516_v30  ;;  %v2869_v6 = vld [vmem:[%s5972_s19 + $0x20] sm:$0xff]  ;;  %v2789_v36 = vld [vmem:[#allocation3] sm:$0x3]  ;;  %v3148_v18 = vld [vmem:[%s5973_s25 + $0x8] sm:$0xff] }
0x1060   : > { %4557 = vmatprep.subr.bf16.mxu1 %v5488_v5  ;;  %v5511_v39 = vpack.c.bf16 %v2868_v24, %v2867_v28  ;;  %v5516_v40 = vsel %vm2815_vm8, %v2992_v51, %v5485_v62  ;;  %v2832_v35 = vrot.slane %v5334_v60, 7  ;;  %v3282_v38 = vsel %vm2827_vm12, %v2847_v10, %v3281_v14  ;;  %4541 = vmatprep.subr.bf16.mxu0 %v5494_v32  ;;  %v3147_v7 = vld [vmem:[%s5973_s25] sm:$0xff] }
0x1061   : > { %4778 = vrot.lane.b32.xlu1 %v4777_v3, %s4877_s8  ;;  %4559 = vmatpush3.bf16.msra.mxu1 %v5488_v5  ;;  %v5531_v15 = vsel %vm2778_vm6, %v5385_v26, %v3135_v46  ;;  %v5535_v44 = vpack.c.bf16 %v3008_v31, %v3007_v20  ;;  %v2812_v45 = vrot.slane %v5363_v13, 7  ;;  %v3397_v47 = vsel %vm2821_vm10, %v2982_v8, %v3396_v37  ;;  %v3009_v26 = vld [vmem:[%s5921_s16 + $0x30] sm:$0xff]  ;;  %v3010_v46 = vld [vmem:[%s5921_s16 + $0x38] sm:$0xff] }
0x1062   : > { %2996 = vrot.lane.b32.xlu0 %v2993_v29, %s4876_s7  ;;  %4561 = vmatprep.subr.bf16.mxu1 %v5496_v33  ;;  %v3518_v10 = vsel %vm2827_vm12, %v3131_v42, %v3517_v22  ;;  %v2814_v13 = vrot.slane %v5339_v52, 6  ;;  %v2817_v48 = vrot.slane %v5341_v63, 5  ;;  %v5553_v49 = vpack.c.bf16 %v2870_v41, %v2869_v6  ;;  %v2871_v63 = vld [vmem:[%s5972_s19 + $0x30] sm:$0xff]  ;;  %v3014_v31 = vld [vmem:[%s5921_s16 + $0x58] sm:$0xff] }
0x1063   : > { %4543 = vmatpush3.bf16.msra.mxu0 %v5494_v32  ;;  %v2813_v8 = vsel %vm2778_vm6, %v2812_v45, %v2789_v36  ;;  %v2820_v42 = vrot.slane %v5343_v0, 4  ;;  %v2823_v50 = vrot.slane %v5345_v1, 3  ;;  %v3283_v51 = vsel %vm2830_vm13, %v2849_v19, %v3282_v38  ;;  %v2872_v0 = vld [vmem:[%s5972_s19 + $0x38] sm:$0xff]  ;;  %v3013_v20 = vld [vmem:[%s5921_s16 + $0x50] sm:$0xff] }
0x1064   : > { %4545 = vmatprep.subr.bf16.mxu0 %v5511_v39  ;;  %v5566_v52 = vsel %vm2778_vm6, %v2832_v35, %v5355_v4  ;;  %v2816_v1 = vsel %vm2815_vm8, %v2814_v13, %v2813_v8  ;;  %v2826_v55 = vrot.slane %v5347_v2, 2  ;;  %v5577_v19 = vpack.c.bf16 %v3010_v46, %v3009_v26  ;;  %v3150_v38 = vld [vmem:[%s5973_s25 + $0x18] sm:$0xff]  ;;  %v3151_v26 = vld [vmem:[%s5973_s25 + $0x20] sm:$0xff]  ;;  %v3152_v46 = vld [vmem:[%s5973_s25 + $0x28] sm:$0xff] }
0x1065   : > { %3289 = vrot.lane.b32.xlu1 %v3286_v34, %s4875_s27  ;;  %4563 = vmatpush3.bf16.msra.mxu1 %v5496_v33  ;;  %v2819_v56 = vsel %vm2818_vm9, %v2817_v48, %v2816_v1  ;;  %v2829_v57 = vrot.slane %v5353_v54, 1  ;;  %v2834_v58 = vrot.slane %v5336_v61, 6  ;;  %v3398_v59 = vsel %vm2824_vm11, %v2984_v11, %v3397_v47 }
0x1066   : > { %3120 = vrot.lane.b32.xlu0 %v5336_v61, %s4876_s7  ;;  %4565 = vmatprep.subr.bf16.mxu1 %v5535_v44  ;;  %v3519_v3 = vsel %vm2830_vm13, %v3133_v43, %v3518_v10  ;;  %v3012_v61 = vld [vmem:[%s5921_s16 + $0x48] sm:$0xff]  ;;  %v5599_v2 = vpack.c.bf16 %v2872_v0, %v2871_v63  ;;  %v3267_v25 = vsel %vm2815_vm8, %v2812_v45, %v2789_v36  ;;  %v3149_v36 = vld [vmem:[%s5973_s25 + $0x10] sm:$0xff]  ;;  %v3154_v0 = vld [vmem:[%s5973_s25 + $0x38] sm:$0xff] }
0x1067   : > { %4547 = vmatpush3.bf16.msra.mxu0 %v5511_v39  ;;  %v2835_v11 = vsel %vm2815_vm8, %v2834_v58, %v5566_v52  ;;  %v5606_v43 = vsel %vm2778_vm6, %v5355_v4, %v2829_v57  ;;  %v5623_v27 = vpack.c.bf16 %v3012_v61, %v3011_v16  ;;  %v3268_v29 = vsel %vm2818_vm9, %v2814_v13, %v3267_v25 }
0x1068   : > { %4549 = vmatprep.subr.bf16.mxu0 %v5553_v49  ;;  %v5619_v23 = vsel %vm2815_vm8, %v2832_v35, %v5606_v43  ;;  %v3399_v30 = vsel %vm2827_vm12, %v2986_v12, %v3398_v59  ;;  %v4782_v14 = vpack.i.bf16 %v5531_v15, %v3519_v3  ;;  %v3269_v34 = vsel %vm2821_vm10, %v2817_v48, %v3268_v29  ;;  %v3156_v59 = vld [vmem:[%s5973_s25 + $0x48] sm:$0xff] }
0x1069   : > { %3508 = vrot.lane.b32.xlu1 %v5435_v53, %s4875_s27  ;;  %v2822_v53 = vsel %vm2821_vm10, %v2820_v42, %v2819_v56  ;;  %4567 = vmatpush3.bf16.msra.mxu1 %v5535_v44  ;;  %v5628_v24 = vsel %vm2818_vm9, %v2834_v58, %v5619_v23  ;;  %v5646_v37 = vpack.c.bf16 %v3148_v18, %v3147_v7  ;;  %v3155_v58 = vld [vmem:[%s5973_s25 + $0x40] sm:$0xff]  ;;  %vm3248_vm6 = vcmask 57344  }
0x106a   : > { %v2825_v60 = vsel %vm2824_vm11, %v2823_v50, %v2822_v53  ;;  %3287 = vrot.lane.b32.xlu0 %v3283_v51, %s4875_s27  ;;  %4569 = vmatprep.subr.bf16.mxu1 %v5577_v19  ;;  %v3270_v54 = vsel %vm2824_vm11, %v2820_v42, %v3269_v34  ;;  %v3400_v22 = vsel %vm2830_vm13, %v2988_v17, %v3399_v30  ;;  %vm3637_vm8 = vcmask 1040384  }
0x106b   : > { %v2828_v9 = vsel %vm2827_vm12, %v2826_v55, %v2825_v60  ;;  %4551 = vmatpush3.bf16.msra.mxu0 %v5553_v49  ;;  %v3271_v12 = vsel %vm2827_vm12, %v2823_v50, %v3270_v54  ;;  %v5682_v47 = vpack.c.bf16 %v3150_v38, %v3149_v36  ;;  %v5699_v50 = vpack.c.bf16 %v3152_v46, %v3151_v26  ;;  %v3157_v60 = vld [vmem:[%s5973_s25 + $0x50] sm:$0xff] }
0x106c   : > { %v2831_v28 = vsel %vm2830_vm13, %v2829_v57, %v2828_v9  ;;  %4553 = vmatprep.subr.bf16.mxu0 %v5599_v2  ;;  %v3272_v35 = vsel %vm2830_vm13, %v2826_v55, %v3271_v12  ;;  %v5730_v61 = vpack.c.bf16 %v3156_v59, %v3155_v58  ;;  %v3161_v54 = vld [vmem:[%s5973_s25 + $0x70] sm:$0xff]  ;;  %vm3722_vm9 = vcmask 50176  }
0x106d   : > { %3405 = vrot.lane.b32.xlu1 %v5516_v40, %s4876_s7  ;;  %4571 = vmatpush3.bf16.msra.mxu1 %v5577_v19  ;;  %v5657_v40 = vpack.c.bf16 %v3014_v31, %v3013_v20 }
0x106e   : > { %3392 = vrot.lane.b32.xlu0 %v5468_v21, %s4875_s27  ;;  %4573 = vmatprep.subr.bf16.mxu1 %v5623_v27  ;;  %s5977_s27 = sld [smem:[#allocation25_spill]] }
0x106f   : > { %4555 = vmatpush3.bf16.msra.mxu0 %v5599_v2 }
0x1070   : > { %4581 = vmatprep.subr.bf16.mxu0 %v5646_v37 }
0x1071   : > { %4783 = vrot.lane.b32.xlu1 %v4782_v14, %s4877_s8  ;;  %4575 = vmatpush3.bf16.msra.mxu1 %v5623_v27 }
0x1072   : > { %3403 = vrot.lane.b32.xlu0 %v3400_v22, %s4876_s7  ;;  %4577 = vmatprep.subr.bf16.mxu1 %v5657_v40 }
0x1075   : > { %4579 = vmatpush3.bf16.msra.mxu1 %v5657_v40 }
0x1076   : > { %3511 = vrot.lane.b32.xlu0 %v5485_v62, %s4876_s7  ;;  %4613 = vmatprep.subr.bf16.mxu1 %v5494_v32 }
0x10c3   : > { %v2976_v17 = vpop.permute.xlu1 %2975 }
0x10c4   : > { %v3000_v13 = vsel %vm919_vm1, %v5566_v52, %v2976_v17  ;;  %v3153_v52 = vld [vmem:[%s5973_s25 + $0x30] sm:$0xff] }
0x10c5   : > { %v5716_v56 = vpack.c.bf16 %v3154_v0, %v3153_v52 }
0x10cb   : > { %v2995_v21 = vpop.permute.xlu1 %2994 }
0x10cc   : > { %v2858_v6 = vpop.permute.xlu0 %2857 }
0x10cd   : > { %v2863_v41 = vsel %vm919_vm1, %v2831_v28, %v2858_v6  ;;  %v3159_v28 = vld [vmem:[%s5973_s25 + $0x60] sm:$0xff] }
0x10ce   : > { %4329 = vmatprep.mubr.msk.f32.mxu0 %vm2880_vm14, %v2863_v41  ;;  %v3001_v62 = vsel %vm2880_vm14, %v2863_v41, %v2995_v21 }
0x10cf   : > { %v5679_v15 = vpop.permute.xlu1 %3117  ;;  %4356 = vmatprep.mubr.msk.f32.mxu1 %vm3022_vm15, %v3001_v62 }
0x10d0   : > { %v2860_v45 = vpop.permute.xlu0 %2859 }
0x10d1   : > { %v2864_v10 = vsel %vm919_vm1, %v2835_v11, %v2860_v45  ;;  %v3158_v11 = vld [vmem:[%s5973_s25 + $0x58] sm:$0xff] }
0x10d2   : > { %4330 = vmatmul.mubr.msk.f32.vlgmr.msra.gmra.mrb[0].mxu0 %vm2880_vm14, %v2864_v10  ;;  %v5743_v7 = vpack.c.bf16 %v3158_v11, %v3157_v60  ;;  %v3992_v60 = vld [vmem:[%s5976_s17] ss:$0 sm:$0xff] }
0x10d3   : > { %v5694_v48 = vpop.permute.xlu1 %4778  ;;  %4583 = vmatpush3.bf16.msra.mxu0 %v5646_v37 }
0x10d4   : > { %v4780_v8 = vunpack.i.l.bf16 %v5694_v48  ;;  %v2997_v42 = vpop.permute.xlu0 %2996  ;;  %4585 = vmatprep.subr.bf16.mxu0 %v5682_v47  ;;  %v4781_v45 = vunpack.i.h.bf16 %v5694_v48 }
0x10d5   : > { %v3002_v51 = vsel %vm2880_vm14, %v3000_v13, %v2997_v42 }
0x10d6   : > { %v3145_v63 = vsel %vm3022_vm15, %v3001_v62, %v4780_v8  ;;  %4357 = vmatmul.mubr.msk.f32.vlgmr.msra.gmra.mrb[0].mxu1 %vm3022_vm15, %v3002_v51  ;;  %v3143_v62 = vsel %vm919_vm1, %v5355_v4, %v5679_v15 }
0x10d7   : > { %4391 = vmatprep.mubr.f32.mxu0 %v3145_v63  ;;  %v3290_v1 = vpop.permute.xlu1 %3289  ;;  %4587 = vmatpush3.bf16.msra.mxu0 %v5682_v47 }
0x10d8   : > { %4615 = vmatpush3.bf16.msra.mxu1 %v5494_v32  ;;  %4589 = vmatprep.subr.bf16.mxu0 %v5699_v50  ;;  %v5714_v55 = vpop.permute.xlu0 %3120  ;;  %v3294_v57 = vsel %vm919_vm1, %v5628_v24, %v3290_v1  ;;  %v3160_v24 = vld [vmem:[%s5973_s25 + $0x68] sm:$0xff] }
0x10d9   : > { %4617 = vmatprep.subr.bf16.mxu1 %v5511_v39  ;;  %v3299_v3 = vrot.slane %v3294_v57, 1  ;;  %v4604_v20 = vpack.c.bf16 %v3160_v24, %v3159_v28  ;;  %v3144_v26 = vsel %vm2880_vm14, %v3143_v62, %v5714_v55 }
0x10da   : > { %v3146_v4 = vsel %vm3022_vm15, %v3144_v26, %v4781_v45 }
0x10db   : > { %v3509_v32 = vpop.permute.xlu1 %3508  ;;  %4591 = vmatpush3.bf16.msra.mxu0 %v5699_v50 }
0x10dc   : > { %4619 = vmatpush3.bf16.msra.mxu1 %v5511_v39  ;;  %4593 = vmatprep.subr.bf16.mxu0 %v5716_v56  ;;  %v3288_v16 = vpop.permute.xlu0 %3287 }
0x10dd   : > { %4621 = vmatprep.subr.bf16.mxu1 %v5553_v49  ;;  %v3293_v53 = vsel %vm919_vm1, %v3272_v35, %v3288_v16 }
0x10de   : > { %v3298_v39 = vrot.slane %v3293_v53, 1 }
0x10df   : > { %v3406_v9 = vpop.permute.xlu1 %3405  ;;  %4595 = vmatpush3.bf16.msra.mxu0 %v5716_v56 }
0x10e0   : > { %4623 = vmatpush3.bf16.msra.mxu1 %v5553_v49  ;;  %4597 = vmatprep.subr.bf16.mxu0 %v5730_v61  ;;  %v3300_v18 = vsel %vm3297_vm0, %v3298_v39, %v3299_v3  ;;  %v3393_v25 = vpop.permute.xlu0 %3392 }
0x10e1   : > { %4625 = vmatprep.subr.bf16.mxu1 %v5599_v2  ;;  %4410 = vmatprep.mubr.msk.f32.mxu1 %vm2880_vm14, %v3300_v18  ;;  %v3409_v49 = vsel %vm919_vm1, %v5619_v23, %v3393_v25  ;;  %v3162_v23 = vld [vmem:[%s5973_s25 + $0x78] sm:$0xff] }
0x10e2   : > { %v3411_v29 = vsel %vm2880_vm14, %v3409_v49, %v3406_v9  ;;  %v4608_v21 = vpack.c.bf16 %v3162_v23, %v3161_v54 }
0x10e3   : > { %v4784_v30 = vpop.permute.xlu1 %4783  ;;  %4599 = vmatpush3.bf16.msra.mxu0 %v5730_v61  ;;  %v3415_v31 = vrot.slane %v3411_v29, 1 }
0x10e4   : > { %4627 = vmatpush3.bf16.msra.mxu1 %v5599_v2  ;;  %v4785_v14 = vunpack.i.l.bf16 %v4784_v30  ;;  %4601 = vmatprep.subr.bf16.mxu0 %v5743_v7  ;;  %v3404_v34 = vpop.permute.xlu0 %3403  ;;  %v3527_v2 = vsel %vm919_vm1, %v5606_v43, %v3509_v32  ;;  %v4786_v35 = vunpack.i.h.bf16 %v4784_v30  ;;  %vm2965_vm1 = vcmask 59392  }
0x10e5   : > { %4629 = vmatprep.subr.bf16.mxu1 %v5488_v5  ;;  %v3410_v12 = vsel %vm2880_vm14, %v3293_v53, %v3404_v34 }
0x10e6   : > { %v3414_v22 = vrot.slane %v3410_v12, 1  ;;  %v3529_v17 = vsel %vm3022_vm15, %v3410_v12, %v4785_v14 }
0x10e7   : > { %4411 = vmatmul.mubr.msk.f32.vlgmr.msra.gmra.mrb[2].mxu1 %vm2880_vm14, %v3299_v3  ;;  %4603 = vmatpush3.bf16.msra.mxu0 %v5743_v7  ;;  %v3533_v43 = vrot.slane %v3529_v17, 1 }
0x10e8   : > { %4631 = vmatpush3.bf16.msra.mxu1 %v5488_v5  ;;  %4605 = vmatprep.subr.bf16.mxu0 %v4604_v20  ;;  %v3512_v6 = vpop.permute.xlu0 %3511  ;;  %v3416_v41 = vsel %vm3297_vm0, %v3414_v22, %v3415_v31 }
0x10e9   : > { %4633 = vmatprep.subr.bf16.mxu1 %v5496_v33  ;;  %v3528_v36 = vsel %vm2880_vm14, %v3527_v2, %v3512_v6  ;;  %4437 = vmatprep.mubr.msk.f32.mxu1 %vm3022_vm15, %v3416_v41  ;;  %v4878_v41 = vmov 0.0|0.0  }
0x10ea   : > { %v3530_v38 = vsel %vm3022_vm15, %v3528_v36, %v4786_v35 }
0x10eb   : > { %4607 = vmatpush3.bf16.msra.mxu0 %v4604_v20  ;;  %v3534_v5 = vrot.slane %v3530_v38, 1 }
0x10ec   : > { %4635 = vmatpush3.bf16.msra.mxu1 %v5496_v33  ;;  %4609 = vmatprep.subr.bf16.mxu0 %v4608_v21  ;;  %v3986_v33 = vld [vmem:[%s5974_s14] ss:$0 sm:$0xff] }
0x10ed   : > { %4637 = vmatprep.subr.bf16.mxu1 %v5535_v44  ;;  %v3535_v10 = vsel %vm3297_vm0, %v3533_v43, %v3534_v5 }
0x10ef   : > { %4611 = vmatpush3.bf16.msra.mxu0 %v4608_v21 }
0x10f0   : > { %4639 = vmatpush3.bf16.msra.mxu1 %v5535_v44  ;;  %4653 = vmatprep.subr.bf16.mxu0 %v5646_v37 }
0x10f1   : > { %4641 = vmatprep.subr.bf16.mxu1 %v5577_v19 }
0x10f2   : > { %4392 = vmatmul.mubr.f32.vlgmr.msra.gmra.mrb[2].mxu0 %v3146_v4 }
0x10f3   : > { %4655 = vmatpush3.bf16.msra.mxu0 %v5646_v37  ;;  %4472 = vmatprep.mubr.f32.mxu0 %v3535_v10 }
0x10f4   : > { %4643 = vmatpush3.bf16.msra.mxu1 %v5577_v19  ;;  %4657 = vmatprep.subr.bf16.mxu0 %v5682_v47 }
0x10f5   : > { %4645 = vmatprep.subr.bf16.mxu1 %v5623_v27 }
0x10f7   : > { %4659 = vmatpush3.bf16.msra.mxu0 %v5682_v47 }
0x10f8   : > { %4647 = vmatpush3.bf16.msra.mxu1 %v5623_v27  ;;  %4661 = vmatprep.subr.bf16.mxu0 %v5699_v50 }
0x10f9   : > { %4649 = vmatprep.subr.bf16.mxu1 %v5657_v40 }
0x10fb   : > { %4663 = vmatpush3.bf16.msra.mxu0 %v5699_v50 }
0x10fc   : > { %4651 = vmatpush3.bf16.msra.mxu1 %v5657_v40  ;;  %4665 = vmatprep.subr.bf16.mxu0 %v5716_v56  ;;  %v3989_v40 = vld [vmem:[%s5975_s5] ss:$0 sm:$0xff] }
0x10fd   : > { %4684 = vmatprep.subr.bf16.mxu1 %v4878_v41 }
0x10ff   : > { %4438 = vmatmul.mubr.msk.f32.vlgmr.msra.gmra.mrb[4].mxu1 %vm3022_vm15, %v3415_v31  ;;  %4667 = vmatpush3.bf16.msra.mxu0 %v5716_v56 }
0x1100   : > { %4669 = vmatprep.subr.bf16.mxu0 %v5730_v61 }
0x1103   : > { %4671 = vmatpush3.bf16.msra.mxu0 %v5730_v61 }
0x1104   : > { %4673 = vmatprep.subr.bf16.mxu0 %v5743_v7 }
0x1107   : > { %4675 = vmatpush3.bf16.msra.mxu0 %v5743_v7 }
0x1108   : > { %4677 = vmatprep.subr.bf16.mxu0 %v4604_v20 }
0x110b   : > { %4679 = vmatpush3.bf16.msra.mxu0 %v4604_v20 }
0x110c   : > { %4681 = vmatprep.subr.bf16.mxu0 %v4608_v21 }
0x110f   : > { %4683 = vmatpush3.bf16.msra.mxu0 %v4608_v21 }
0x1112   : > { %4473 = vmatmul.mubr.f32.vlgmr.msra.gmra.mrb[4].mxu0 %v3534_v5 }
0x11a5   : > { %v4331_v44 = vpop.f32.mrb[0].mxu0 }
0x11a6   : > { %v2959_v19 = vadd.f32 %v4331_v44, %v3986_v33  ;;  %v2953_v27 = vpop.f32.mrb[1].mxu0 }
0x11a7   : > { %v2954_v37 = vadd.f32 %v3986_v33, %v2953_v27 }
0x11a8   : > { %v2963_v15 = vmax.f32 %v2959_v19, 0.0 }
0x11a9   : > { %v2962_v47 = vmax.f32 %v2954_v37, 0.0  ;;  %v4358_v46 = vpop.f32.mrb[0].mxu1 }
0x11aa   : > { %v2966_v13 = vsel %vm2965_vm1, %v2963_v15, -inf  ;;  %v3101_v48 = vadd.f32 %v4358_v46, %v3989_v40  ;;  %v3095_v8 = vpop.f32.mrb[1].mxu1  ;;  %v3639_v15 = vld [vmem:[%s5977_s27] sm:$0xff] }
0x11ab   : > { %v2964_v42 = vsel %vm1004_vm3, %v2962_v47, -inf  ;;  %v3096_v50 = vadd.f32 %v3989_v40, %v3095_v8  ;;  %v3640_v47 = vld [vmem:[%s5977_s27 + $0x8] sm:$0xff] }
0x11ac   : > { %v5816_v51 = vmax.f32 %v2964_v42, %v2966_v13  ;;  %v3105_v63 = vmax.f32 %v3101_v48, 0.0  ;;  %v4685_v48 = vpack.c.bf16 %v3640_v47, %v3639_v15  ;;  %v4880_v42 = vmov 0.0  }
0x11ad   : > { %v3104_v52 = vmax.f32 %v3096_v50, 0.0  ;;  %4481 = vmatprep.mubr.msk.f32.mxu1 %vm4881_vm7, %v4880_v42 }
0x11ae   : > { %v3108_v0 = vsel %vm3107_vm2, %v3105_v63, -inf  ;;  %4686 = vmatpush3.bf16.msra.mxu1 %v4685_v48 }
0x11af   : > { %v3106_v1 = vsel %vm1004_vm3, %v3104_v52, -inf  ;;  %4479 = vmatprep.subr.mxu1 %v4880_v42  ;;  %v3641_v52 = vld [vmem:[%s5977_s27 + $0x10] sm:$0xff] }
0x11b0   : > { %v3109_v55 = vmax.f32 %v3106_v1, %v3108_v0 }
0x11b2   : > { %v3110_v31 = vrot.slane %v3109_v55, 4  ;;  %4480 = vmatpush3.msra.mxu1 %v3641_v52 }
0x11b4   : > { %v3111_v2 = vmax.f32 %v3109_v55, %v3110_v31 }
0x11b6   : > { %v3112_v17 = vrot.slane %v3111_v2, 2 }
0x11b8   : > { %v3113_v43 = vmax.f32 %v3111_v2, %v3112_v17 }
0x11ba   : > { %v4412_v56 = vpop.f32.mrb[2].mxu1  ;;  %v3114_v5 = vrot.slane %v3113_v43, 1 }
0x11bb   : > { %v3377_v57 = vadd.f32 %v4412_v56, %v3986_v33  ;;  %v3371_v58 = vpop.f32.mrb[3].mxu1 }
0x11bc   : > { %v3372_v59 = vadd.f32 %v3986_v33, %v3371_v58  ;;  %v3115_v19 = vmax.f32 %v3113_v43, %v3114_v5 }
0x11bd   : > { %v3381_v32 = vmax.f32 %v3377_v57, 0.0 }
0x11be   : > { %v3380_v3 = vmax.f32 %v3372_v59, 0.0 }
0x11bf   : > { %v3383_v16 = vsel %vm2965_vm1, %v3381_v32, -inf }
0x11c0   : > { %v3382_v61 = vsel %vm1004_vm3, %v3380_v3, -inf  ;;  %v2968_v3 = vrot.slane %v5816_v51, 4 }
0x11c1   : > { %v5822_v53 = vmax.f32 %v3382_v61, %v3383_v16 }
0x11c2   : > { %v2969_v61 = vmax.f32 %v5816_v51, %v2968_v3 }
0x11c3   : > { %v3385_v32 = vrot.slane %v5822_v53, 4 }
0x11c5   : > { %v4393_v11 = vpop.f32.mrb[2].mxu0  ;;  %v3386_v16 = vmax.f32 %v5822_v53, %v3385_v32 }
0x11c6   : > { %v3242_v39 = vadd.f32 %v4393_v11, %v3992_v60  ;;  %v3236_v9 = vpop.f32.mrb[3].mxu0 }
0x11c7   : > { %v3237_v7 = vadd.f32 %v3992_v60, %v3236_v9 }
0x11c8   : > { %v3246_v18 = vmax.f32 %v3242_v39, 0.0  ;;  %v2970_v39 = vrot.slane %v2969_v61, 2 }
0x11c9   : > { %v3245_v25 = vmax.f32 %v3237_v7, 0.0 }
0x11ca   : > { %v3249_v28 = vsel %vm3248_vm6, %v3246_v18, -inf  ;;  %v2971_v7 = vmax.f32 %v2969_v61, %v2970_v39 }
0x11cb   : > { %v3247_v24 = vsel %vm1004_vm3, %v3245_v25, -inf }
0x11cc   : > { %v3250_v49 = vmax.f32 %v3247_v24, %v3249_v28  ;;  %v2972_v28 = vrot.slane %v2971_v7, 1 }
0x11ce   : > { %v3251_v33 = vrot.slane %v3250_v49, 4 }
0x11d0   : > { %v3252_v46 = vmax.f32 %v3250_v49, %v3251_v33 }
0x11d2   : > { %v4439_v29 = vpop.f32.mrb[4].mxu1  ;;  %v3253_v50 = vrot.slane %v3252_v46, 2 }
0x11d3   : > { %v3493_v30 = vadd.f32 %v4439_v29, %v3989_v40  ;;  %v3487_v14 = vpop.f32.mrb[5].mxu1 }
0x11d4   : > { %v3488_v20 = vadd.f32 %v3989_v40, %v3487_v14  ;;  %v3254_v55 = vmax.f32 %v3252_v46, %v3253_v50  ;;  %v2973_v14 = vmax.f32 %v2971_v7, %v2972_v28 }
0x11d5   : > { %v3497_v34 = vmax.f32 %v3493_v30, 0.0 }
0x11d6   : > { %v3496_v54 = vmax.f32 %v3488_v20, 0.0  ;;  %v3255_v58 = vrot.slane %v3254_v55, 1 }
0x11d7   : > { %v3499_v23 = vsel %vm3107_vm2, %v3497_v34, -inf }
0x11d8   : > { %v3498_v12 = vsel %vm1004_vm3, %v3496_v54, -inf  ;;  %v3256_v59 = vmax.f32 %v3254_v55, %v3255_v58  ;;  %v3997_v54 = vld [vmem:[%s5978_s28] ss:$0 sm:$0xff] }
0x11d9   : > { %v3500_v22 = vmax.f32 %v3498_v12, %v3499_v23  ;;  %v3724_v12 = vld [vmem:[%s5979_s0] sm:$0x3] }
0x11db   : > { %v3501_v35 = vrot.slane %v3500_v22, 4 }
0x11dd   : > { %v3502_v21 = vmax.f32 %v3500_v22, %v3501_v35 }
0x11df   : > { %v3503_v6 = vrot.slane %v3502_v21, 2 }
0x11e1   : > { %v3504_v36 = vmax.f32 %v3502_v21, %v3503_v6 }
0x11e3   : > { %v3505_v38 = vrot.slane %v3504_v36, 1 }
0x11e5   : > { %v3506_v62 = vmax.f32 %v3504_v36, %v3505_v38  ;;  %v4474_v45 = vpop.f32.mrb[4].mxu0 }
0x11e6   : > { %v3610_v10 = vadd.f32 %v4474_v45, %v3992_v60  ;;  %v3604_v26 = vpop.f32.mrb[5].mxu0 }
0x11e7   : > { %3625 = vrot.lane.b32.xlu0 %v3506_v62, %s4879_s3  ;;  %v3605_v4 = vadd.f32 %v3992_v60, %v3604_v26  ;;  %v3387_v60 = vrot.slane %v3386_v16, 2 }
0x11e8   : > { %v3614_v44 = vmax.f32 %v3610_v10, 0.0 }
0x11e9   : > { %v3613_v27 = vmax.f32 %v3605_v4, 0.0  ;;  %v3388_v11 = vmax.f32 %v3386_v16, %v3387_v60 }
0x11ea   : > { %v3616_v37 = vsel %vm3248_vm6, %v3614_v44, -inf }
0x11eb   : > { %3258 = vrot.lane.b32.xlu0 %v3115_v19, %s4879_s3  ;;  %v3615_v40 = vsel %vm1004_vm3, %v3613_v27, -inf  ;;  %v3389_v9 = vrot.slane %v3388_v11, 1 }
0x11ec   : > { %v3617_v13 = vmax.f32 %v3615_v40, %v3616_v37 }
0x11ed   : > { %v3390_v25 = vmax.f32 %v3388_v11, %v3389_v9 }
0x11ee   : > { %v3618_v8 = vrot.slane %v3617_v13, 4 }
0x11f0   : > { %v3619_v63 = vmax.f32 %v3617_v13, %v3618_v8 }
0x11f2   : > { %v3620_v0 = vrot.slane %v3619_v63, 2 }
0x11f4   : > { %v3621_v1 = vmax.f32 %v3619_v63, %v3620_v0 }
0x11f6   : > { %v3622_v56 = vrot.slane %v3621_v1, 1 }
0x11f8   : > { %v3623_v57 = vmax.f32 %v3621_v1, %v3622_v56 }
0x11fa   : > { %3629 = vrot.lane.b32.xlu1 %v3623_v57, %s4882_s1 }
0x11fe   : > { %3262 = vrot.lane.b32.xlu1 %v3256_v59, %s4882_s1 }
0x1259   : > { %v3626_v18 = vpop.permute.xlu0 %3625 }
0x125a   : > { %v3632_v24 = vsel %vm1004_vm3, %v3390_v25, %v3626_v18 }
0x125d   : > { %v3259_v29 = vpop.permute.xlu0 %3258 }
0x125e   : > { %v3265_v53 = vsel %vm1004_vm3, %v2973_v14, %v3259_v29  ;;  %vm3742_vm3 = vcmask 1041408  }
0x126c   : > { %v3630_v49 = vpop.permute.xlu1 %3629 }
0x126d   : > { %v3633_v30 = vsel %vm2374_vm5, %v3632_v24, %v3630_v49 }
0x126e   : > { %v3635_v20 = vrot.slane %v3633_v30, 7 }
0x1270   : > { %v3263_v51 = vpop.permute.xlu1 %3262 }
0x1271   : > { %v3266_v31 = vsel %vm2374_vm5, %v3265_v53, %v3263_v51 }
0x1272   : > { %v3638_v34 = vsel %vm3637_vm8, %v3266_v31, %v3635_v20 }
0x1273   : > { %4482 = vmatmul.mubr.msk.f32.vlgmr.msra.gmra.mrb[6].mxu1 %vm2377_vm4, %v3638_v34  ;;  %vm3751_vm4 = vcmask 0  }
0x1346   : > { %v3718_v23 = vpop.f32.mrb[6].mxu1 }
0x1347   : > { %v3719_v2 = vadd.f32 %v3997_v54, %v3718_v23  ;;  %v4483_v22 = vpop.f32.mrb[7].mxu1 }
0x1349   : > { %v3725_v35 = vsel %vm3722_vm9, %v3719_v2, -inf  ;;  %3723 = vst.msk [vmem:[#allocation4] sm:$0x3] %vm3722_vm9, %v3719_v2  ;;  %v3737_v17 = vmul.f32 %v3724_v12, %v3719_v2 }
0x134a   : > { %3726 = vmax.xlane.f32.xlu0 %v3725_v35 }
0x134b   : > { %v3738_v21 = vsel %vm3722_vm9, %v3737_v17, 0.0 }
0x134e   : > { %3739 = vadd.xlane.f32.xlu0 %v3738_v21 }
0x13d7   : > { %v3727_v6 = vpop.xlane.xlu0 %3726 }
0x13d8   : > { %v3728_v41 = vsub.f32 %v3719_v2, %v3727_v6 }
0x13da   : > { %v3729_v36 = vmul.f32 1.442695, %v3728_v41 }
0x13db   : > { %v3740_v26 = vpop.xlane.xlu0 %3739 }
0x13dc   : > { %4787 = vpow2.f32 %v3729_v36 }
0x13e6   : > { %v4788_v43 = vpop.eup %4787 }
0x13e7   : > { %v3731_v38 = vsel %vm3722_vm9, %v4788_v43, 0.0 }
0x13e8   : > { %3732 = vadd.xlane.f32.xlu1 %v3731_v38 }
0x1475   : > { %v3733_v62 = vpop.xlane.xlu1 %3732 }
0x1476   : > { %4789 = vlog2.f32 %v3733_v62 }
0x1480   : > { %v4790_v5 = vpop.eup %4789 }
0x1481   : > { %v3735_v45 = vmul.f32 0.6931472, %v4790_v5 }
0x1483   : > { %v3736_v10 = vadd.f32 %v3735_v45, %v3727_v6 }
0x1485   : > { %v3741_v4 = vsub.f32 %v3736_v10, %v3740_v26 }
0x1487   : > { %v3743_v33 = vsel %vm3742_vm3, %v3741_v4, 0.0 }
0x1488   : > { %v3744_v44 = vrot.slane %v3743_v33, 4 }
0x148a   : > { %v3745_v19 = vadd.f32 %v3744_v44, %v3743_v33 }
0x148c   : > { %v3746_v27 = vrot.slane %v3745_v19, 2 }
0x148e   : > { %v3747_v37 = vadd.f32 %v3746_v27, %v3745_v19 }
0x1490   : > { %v3748_v40 = vrot.slane %v3747_v37, 1 }
0x1492   : > { %v3749_v15 = vadd.f32 %v3748_v40, %v3747_v37 }
0x1494   : > { %v3750_v47 = vmul.f32 0.5, %v3749_v15 }
0x1496   : > { %3752 = vst.msk [vmem:[#allocation6] sm:$0x1] %vm3751_vm4, %v3750_v47 }
0x1497 PF: > { %p4695_p6 = scmp.eq.s32.totalorder %s5016_s26, 11  ;;  %s4883_s23 = smov [#allocation4]  }
0x1498   : > { %s3760_s5 = sshll.u32 %s4883_s23, 4  ;;  %s4884_s22 = smov [#allocation6]   ;;  %s3761_s5 = int_to_ptr.vmem [resolvable:$true] %s3760_s5 }
0x1499   : > { %s3771_s21 = sshll.u32 %s4884_s22, 4  ;;  %s4791_s17 = scalar_lea.vmem %s3761_s5, 32  ;;  %s3772_s21 = int_to_ptr.vmem [resolvable:$true] %s3771_s21 }
0x149a   : > { %p4792_p7 = scmp.ne.s32.totalorder %s3761_s5, %s4791_s17  ;;  %p4798_p10 = scmp.lt.s32.totalorder %s3761_s5, %s3761_s5 }
0x149b   : > { %p4799_p11 = scmp.lt.s32.totalorder %s4791_s17, %s4791_s17 }
0x149c   : > { %p4793_p8 = pnand %p4792_p7, %p4695_p6 }
0x149d   : > { %p4800_p12 = por %p4799_p11, %p4798_p10 }
0x149e   : > { %p4794_p9 = pneg %p4793_p8 }
0x14a0   : > { %p4801_p13 = pnand %p4800_p12, %p4794_p9 }
0x14a2   : > { %4804 = shalt.err (!%p4801_p13)
}
0x14a3   : > { %s5980_s6 = sld [smem:[#allocation28_spill]] }
0x14a9   : > { %s4805_s8 = scalar_lea.hbm %s5980_s6, 32 }
0x14aa   : > { %p4806_p0 = scmp.ne.s32.totalorder %s5980_s6, %s4805_s8  ;;  %p4811_p3 = scmp.lt.u32.totalorder %s4805_s8, %s5980_s6 }
0x14ac   : > { %p4807_p1 = pnand %p4806_p0, %p4695_p6 }
0x14ae   : > { %p4808_p2 = pneg %p4807_p1 }
0x14b0   : > { %p4813_p4 = pnand %p4811_p3, %p4808_p2 }
0x14b2   : > { %4816 = shalt.err (!%p4813_p4)
}
0x14b3   : > { %4688 = dma.vmem_to_hbm [thread:$0]  (%p4695_p6), %s3761_s5, 32, %s5980_s6, [#allocation5]  }
0x14b4   : > { %s4817_s28 = scalar_lea.vmem %s3772_s21, 16  ;;  %s4823_s30 = scalar_lea.vmem %s3772_s21, 32 }
0x14b5   : > { %p4818_p5 = scmp.ne.s32.totalorder %s3772_s21, %s4817_s28  ;;  %p4824_p9 = scmp.lt.s32.totalorder %s3772_s21, %s3772_s21 }
0x14b6   : > { %p4825_p10 = scmp.lt.s32.totalorder %s4823_s30, %s4817_s28 }
0x14b7   : > { %p4819_p7 = pnand %p4818_p5, %p4695_p6 }
0x14b8   : > { %p4826_p11 = por %p4825_p10, %p4824_p9 }
0x14b9   : > { %p4820_p8 = pneg %p4819_p7 }
0x14bb   : > { %p4827_p12 = pnand %p4826_p11, %p4820_p8 }
0x14bd   : > { %4830 = shalt.err (!%p4827_p12)
}
0x14be   : > { %s5981_s23 = sld [smem:[#allocation29_spill]] }
0x14c4   : > { %s4831_s22 = scalar_lea.hbm %s5981_s23, 16 }
0x14c5   : > { %p4832_p13 = scmp.ne.s32.totalorder %s5981_s23, %s4831_s22  ;;  %p4837_p2 = scmp.lt.u32.totalorder %s4831_s22, %s5981_s23 }
0x14c7   : > { %p4833_p0 = pnand %p4832_p13, %p4695_p6 }
0x14c9   : > { %p4834_p1 = pneg %p4833_p0 }
0x14cb   : > { %p4839_p3 = pnand %p4837_p2, %p4834_p1 }
0x14cd   : > { %4842 = shalt.err (!%p4839_p3)
}
0x14ce   : > { %4690 = dma.vmem_to_hbm [thread:$0]  (%p4695_p6), %s3772_s21, 16, %s5981_s23, [#allocation7]  }
0x14cf   : > { %4848 = dma.done.wait (%p4695_p6), [#allocation5], 32  }
0x14d0   : > { %4850 = vsyncadd (%p4695_p6), [#allocation5], 4294967264 }
0x14d1   : > { %4852 = dma.done.wait (%p4695_p6), [#allocation7], 16  }
0x14d2   : > { %4854 = vsyncadd (%p4695_p6), [#allocation7], 4294967280 }
0x14d3 PF: > { %s5982_s29 = sld [smem:[#allocation10_spill]] }
0x14d9   : > { %s37_s5 = sadd.s32 1, %s5982_s29  }
0x14da   : > { %p34_p4 = scmp.ge.s32.totalorder %s37_s5, 14  }
0x14dc   :  { %36 = sbr.rel (!%p34_p4) target bundleno = 22 (0x16), region = 189 }
0x14e3   :  { %3788 = vsyncpa [#allocation5], 1 }
0x14e4   :  { %3790 = vsyncpa [#allocation5 + $0x1], 1 }
0x14e5   :  { %3791 = vsyncpa [#allocation7], 1 }

</bundles_post_ra>
